<compile_context>
chip_gen: v7x
topology: tpu7x:2x2x1
jax: 0.10.0
libtpu: 0.0.40
codegen_flags: <defaults>
</compile_context>

<pallas_src>
import jax
import jax.numpy as jnp
from jax.experimental import pallas as pl
from jax.experimental.pallas import tpu as pltpu

N_EMBD = 384      # n_embd in the PyTorch module (input channel dim C)
HEAD_SIZE = 64    # head_size passed to Head(...)
BATCH = 2
SEQ = 128         # T; must be <= block_size (256) in the reference module


def head_forward(x, w_key, w_query, w_value):
    """Single self-attention head forward (eval mode).

    x: (B, T, C) float32.  Weights: (C, H) float32, stored pre-transposed so
    the kernel computes x @ W (equivalent to PyTorch's x @ weight.T).
    """
    B, T, C = x.shape
    H = w_key.shape[1]
    scale = C ** -0.5            # PyTorch scales by C**-0.5 with C = n_embd

    # Fuse the three projections into one wide matmul; cast to bf16 in the
    # wrapper so HBM traffic is halved and the MXU runs at bf16 rate.
    w_kqv = jnp.concatenate([w_key, w_query, w_value], axis=1).astype(jnp.bfloat16)
    x2d = x.reshape(B * T, C).astype(jnp.bfloat16)

    def kernel(x_ref, w_ref, o_ref):
        # x_ref: (B*T, C) bf16   w_ref: (C, 3H) bf16   o_ref: (T, B*H) f32
        kqv = jnp.dot(x_ref[...], w_ref[...],
                      preferred_element_type=jnp.float32)           # (B*T, 3H)

        row = jax.lax.broadcasted_iota(jnp.int32, (T, T), 0)
        col = jax.lax.broadcasted_iota(jnp.int32, (T, T), 1)
        causal = col <= row                                          # tril mask

        outs = []
        for b in range(B):                      # static unroll (B = 2)
            kqv_b = kqv[b * T:(b + 1) * T, :]
            k = kqv_b[:, 0 * H:1 * H]
            q = kqv_b[:, 1 * H:2 * H]
            v = kqv_b[:, 2 * H:3 * H]

            # Fold the scale into q (T x H, half the elements of wei), feed the
            # MXU bf16, and contract on the H axis of both operands so no k.T
            # is materialized.
            qs = (q * scale).astype(jnp.bfloat16)
            kb = k.astype(jnp.bfloat16)
            wei = jax.lax.dot_general(
                qs, kb,
                dimension_numbers=(((1,), (1,)), ((), ())),
                preferred_element_type=jnp.float32)                  # (T, T)

            # causal mask + numerically stable softmax (f32)
            wei = jnp.where(causal, wei, -jnp.inf)
            wei = wei - jnp.max(wei, axis=-1, keepdims=True)
            p = jnp.exp(wei)
            p = p * pl.reciprocal(jnp.sum(p, axis=-1, keepdims=True),
                                  approx=True)

            # dropout(p) == identity in eval mode.

            out_b = jnp.dot(p.astype(jnp.bfloat16), v.astype(jnp.bfloat16),
                            preferred_element_type=jnp.float32)      # (T, H)
            outs.append(out_b)

        # Lane-dense (T, B*H) = (128, 128) slab -> single unmasked store.
        o_ref[...] = jnp.concatenate(outs, axis=-1).astype(o_ref.dtype)

    out_slab = pl.pallas_call(
        kernel,
        out_shape=jax.ShapeDtypeStruct((T, B * H), jnp.float32),
        grid=(1,),
        in_specs=[
            pl.BlockSpec((B * T, C), lambda i: (0, 0)),
            pl.BlockSpec((C, 3 * H), lambda i: (0, 0)),
        ],
        out_specs=pl.BlockSpec((T, B * H), lambda i: (0, 0)),
        compiler_params=pltpu.CompilerParams(
            dimension_semantics=("arbitrary",)),
    )(x2d, w_kqv)

    # (T, B*H) -> (T, B, H) -> (B, T, H)   (layout plumbing in the wrapper)
    return out_slab.reshape(T, B, H).transpose(1, 0, 2)


def head_reference(x, w_key, w_query, w_value):
    """Plain-JAX f32 reference mirroring the PyTorch forward (eval mode)."""
    B, T, C = x.shape
    k = x @ w_key
    q = x @ w_query
    v = x @ w_value
    wei = (q @ jnp.swapaxes(k, -2, -1)) * (C ** -0.5)
    mask = jnp.tril(jnp.ones((T, T), dtype=bool))
    wei = jnp.where(mask[None, :, :], wei, -jnp.inf)
    wei = jax.nn.softmax(wei, axis=-1)
    return wei @ v


if __name__ == "__main__":
    key = jax.random.PRNGKey(0)
    kx, kk, kq, kv = jax.random.split(key, 4)

    # deterministic "parameters" (nn.Linear(n_embd, head_size, bias=False))
    bound = 1.0 / (N_EMBD ** 0.5)
    w_key = jax.random.uniform(kk, (N_EMBD, HEAD_SIZE), jnp.float32, -bound, bound)
    w_query = jax.random.uniform(kq, (N_EMBD, HEAD_SIZE), jnp.float32, -bound, bound)
    w_value = jax.random.uniform(kv, (N_EMBD, HEAD_SIZE), jnp.float32, -bound, bound)

    x = jax.random.normal(kx, (BATCH, SEQ, N_EMBD), jnp.float32)

    out = jax.block_until_ready(head_forward(x, w_key, w_query, w_value))
    ref = head_reference(x, w_key, w_query, w_value)

    assert out.shape == (BATCH, SEQ, HEAD_SIZE)
    # bf16 MXU operands (f32 accumulation) -> loosen tolerance vs the f32 ref.
    assert jnp.allclose(out, ref, atol=2e-2, rtol=2e-2), "mismatch vs reference"

    print("KERNEL_OK")
</pallas_src>

<mosaic_0001>
module attributes {stable_mosaic.version = 11 : i64} {
  func.func @kernel(%arg0: i32, %arg1: memref<256x384xbf16, #tpu.memory_space<vmem>>, %arg2: memref<384x192xbf16, #tpu.memory_space<vmem>>, %arg3: memref<128x128xf32, #tpu.memory_space<vmem>>) attributes {dimension_semantics = [#tpu.dimension_semantics<arbitrary>], iteration_bounds = array<i64: 1>, scalar_prefetch = 0 : i64, scratch_operands = 0 : i64, tpu.core_type = #tpu.core_type<tc>, window_params = [{pipeline_mode = #tpu.pipeline_mode<synchronous>, transform_indices = @transform_0, window_bounds = array<i64: 256, 384>}, {pipeline_mode = #tpu.pipeline_mode<synchronous>, transform_indices = @transform_1, window_bounds = array<i64: 384, 192>}, {pipeline_mode = #tpu.pipeline_mode<synchronous>, transform_indices = @transform_2, window_bounds = array<i64: 128, 128>}]} {
    %c0 = arith.constant 0 : index
    %c0_0 = arith.constant 0 : index
    %0 = vector.load %arg1[%c0, %c0_0] : memref<256x384xbf16, #tpu.memory_space<vmem>>, vector<256x384xbf16>
    %c0_1 = arith.constant 0 : index
    %c0_2 = arith.constant 0 : index
    %1 = vector.load %arg2[%c0_1, %c0_2] : memref<384x192xbf16, #tpu.memory_space<vmem>>, vector<384x192xbf16>
    %cst = arith.constant dense<0.000000e+00> : vector<256x192xf32>
    %2 = tpu.matmul %0, %1, %cst {dimension_numbers = #tpu.dot_dimension_numbers<[1], [0], [0], [1], [0, 0, 1, 1], [], []>} : vector<256x384xbf16>, vector<384x192xbf16>, vector<256x192xf32> -> vector<256x192xf32>
    %3 = tpu.iota {dimensions = array<i32: 0>} : vector<128x128xi32>
    %4 = tpu.iota {dimensions = array<i32: 1>} : vector<128x128xi32>
    %5 = arith.cmpi sle, %4, %3 : vector<128x128xi32>
    %6 = vector.extract_strided_slice %2 {offsets = [0, 0], sizes = [128, 192], strides = [1, 1]} : vector<256x192xf32> to vector<128x192xf32>
    %7 = vector.extract_strided_slice %6 {offsets = [0, 0], sizes = [128, 64], strides = [1, 1]} : vector<128x192xf32> to vector<128x64xf32>
    %8 = vector.extract_strided_slice %6 {offsets = [0, 64], sizes = [128, 64], strides = [1, 1]} : vector<128x192xf32> to vector<128x64xf32>
    %9 = vector.extract_strided_slice %6 {offsets = [0, 128], sizes = [128, 64], strides = [1, 1]} : vector<128x192xf32> to vector<128x64xf32>
    %cst_3 = arith.constant 0.0510310382 : f32
    %10 = vector.broadcast %cst_3 : f32 to vector<128x64xf32>
    %11 = arith.mulf %8, %10 : vector<128x64xf32>
    %12 = arith.truncf %11 : vector<128x64xf32> to vector<128x64xbf16>
    %13 = arith.truncf %7 : vector<128x64xf32> to vector<128x64xbf16>
    %cst_4 = arith.constant dense<0.000000e+00> : vector<128x128xf32>
    %14 = tpu.matmul %12, %13, %cst_4 {dimension_numbers = #tpu.dot_dimension_numbers<[1], [1], [0], [0], [0, 0, 1, 0], [], []>} : vector<128x64xbf16>, vector<128x64xbf16>, vector<128x128xf32> -> vector<128x128xf32>
    %cst_5 = arith.constant 0xFF800000 : f32
    %15 = vector.broadcast %cst_5 : f32 to vector<128x128xf32>
    %16 = arith.select %5, %14, %15 : vector<128x128xi1>, vector<128x128xf32>
    %cst_6 = arith.constant dense<0xFF800000> : vector<128xf32>
    %17 = vector.multi_reduction <maximumf>, %16, %cst_6 [1] : vector<128x128xf32> to vector<128xf32>
    %18 = vector.shape_cast %17 : vector<128xf32> to vector<128x1xf32>
    %19 = vector.broadcast %18 : vector<128x1xf32> to vector<128x128xf32>
    %20 = arith.subf %16, %19 : vector<128x128xf32>
    %21 = math.exp %20 : vector<128x128xf32>
    %cst_7 = arith.constant dense<0.000000e+00> : vector<128xf32>
    %22 = vector.multi_reduction <add>, %21, %cst_7 [1] : vector<128x128xf32> to vector<128xf32>
    %23 = vector.shape_cast %22 : vector<128xf32> to vector<128x1xf32>
    %24 = tpu.reciprocal %23 {approx = true} : vector<128x1xf32> -> vector<128x1xf32>
    %25 = vector.broadcast %24 : vector<128x1xf32> to vector<128x128xf32>
    %26 = arith.mulf %21, %25 : vector<128x128xf32>
    %27 = arith.truncf %26 : vector<128x128xf32> to vector<128x128xbf16>
    %28 = arith.truncf %9 : vector<128x64xf32> to vector<128x64xbf16>
    %cst_8 = arith.constant dense<0.000000e+00> : vector<128x64xf32>
    %29 = tpu.matmul %27, %28, %cst_8 {dimension_numbers = #tpu.dot_dimension_numbers<[1], [0], [0], [1], [0, 0, 1, 1], [], []>} : vector<128x128xbf16>, vector<128x64xbf16>, vector<128x64xf32> -> vector<128x64xf32>
    %30 = vector.extract_strided_slice %2 {offsets = [128, 0], sizes = [128, 192], strides = [1, 1]} : vector<256x192xf32> to vector<128x192xf32>
    %31 = vector.extract_strided_slice %30 {offsets = [0, 0], sizes = [128, 64], strides = [1, 1]} : vector<128x192xf32> to vector<128x64xf32>
    %32 = vector.extract_strided_slice %30 {offsets = [0, 64], sizes = [128, 64], strides = [1, 1]} : vector<128x192xf32> to vector<128x64xf32>
    %33 = vector.extract_strided_slice %30 {offsets = [0, 128], sizes = [128, 64], strides = [1, 1]} : vector<128x192xf32> to vector<128x64xf32>
    %cst_9 = arith.constant 0.0510310382 : f32
    %34 = vector.broadcast %cst_9 : f32 to vector<128x64xf32>
    %35 = arith.mulf %32, %34 : vector<128x64xf32>
    %36 = arith.truncf %35 : vector<128x64xf32> to vector<128x64xbf16>
    %37 = arith.truncf %31 : vector<128x64xf32> to vector<128x64xbf16>
    %cst_10 = arith.constant dense<0.000000e+00> : vector<128x128xf32>
    %38 = tpu.matmul %36, %37, %cst_10 {dimension_numbers = #tpu.dot_dimension_numbers<[1], [1], [0], [0], [0, 0, 1, 0], [], []>} : vector<128x64xbf16>, vector<128x64xbf16>, vector<128x128xf32> -> vector<128x128xf32>
    %cst_11 = arith.constant 0xFF800000 : f32
    %39 = vector.broadcast %cst_11 : f32 to vector<128x128xf32>
    %40 = arith.select %5, %38, %39 : vector<128x128xi1>, vector<128x128xf32>
    %cst_12 = arith.constant dense<0xFF800000> : vector<128xf32>
    %41 = vector.multi_reduction <maximumf>, %40, %cst_12 [1] : vector<128x128xf32> to vector<128xf32>
    %42 = vector.shape_cast %41 : vector<128xf32> to vector<128x1xf32>
    %43 = vector.broadcast %42 : vector<128x1xf32> to vector<128x128xf32>
    %44 = arith.subf %40, %43 : vector<128x128xf32>
    %45 = math.exp %44 : vector<128x128xf32>
    %cst_13 = arith.constant dense<0.000000e+00> : vector<128xf32>
    %46 = vector.multi_reduction <add>, %45, %cst_13 [1] : vector<128x128xf32> to vector<128xf32>
    %47 = vector.shape_cast %46 : vector<128xf32> to vector<128x1xf32>
    %48 = tpu.reciprocal %47 {approx = true} : vector<128x1xf32> -> vector<128x1xf32>
    %49 = vector.broadcast %48 : vector<128x1xf32> to vector<128x128xf32>
    %50 = arith.mulf %45, %49 : vector<128x128xf32>
    %51 = arith.truncf %50 : vector<128x128xf32> to vector<128x128xbf16>
    %52 = arith.truncf %33 : vector<128x64xf32> to vector<128x64xbf16>
    %cst_14 = arith.constant dense<0.000000e+00> : vector<128x64xf32>
    %53 = tpu.matmul %51, %52, %cst_14 {dimension_numbers = #tpu.dot_dimension_numbers<[1], [0], [0], [1], [0, 0, 1, 1], [], []>} : vector<128x128xbf16>, vector<128x64xbf16>, vector<128x64xf32> -> vector<128x64xf32>
    %54 = tpu.concatenate %29, %53 in 1 : vector<128x64xf32>, vector<128x64xf32> -> vector<128x128xf32>
    %c0_15 = arith.constant 0 : index
    %c0_16 = arith.constant 0 : index
    %55 = vector.load %arg3[%c0_15, %c0_16] : memref<128x128xf32, #tpu.memory_space<vmem>>, vector<128x128xf32>
    tpu.vector_store %arg3[%c0_15, %c0_16], %54 {strides = array<i32>} : memref<128x128xf32, #tpu.memory_space<vmem>>, vector<128x128xf32>,
    return
  }
  func.func @transform_0(%arg0: i32) -> (i32, i32) {
    %c0_i32 = arith.constant 0 : i32
    %c0_i32_0 = arith.constant 0 : i32
    %c0_i32_1 = arith.constant 0 : i32
    return %c0_i32, %c0_i32_0 : i32, i32
  }
  func.func @transform_1(%arg0: i32) -> (i32, i32) {
    %c0_i32 = arith.constant 0 : i32
    %c0_i32_0 = arith.constant 0 : i32
    %c0_i32_1 = arith.constant 0 : i32
    return %c0_i32, %c0_i32_0 : i32, i32
  }
  func.func @transform_2(%arg0: i32) -> (i32, i32) {
    %c0_i32 = arith.constant 0 : i32
    %c0_i32_0 = arith.constant 0 : i32
    %c0_i32_1 = arith.constant 0 : i32
    return %c0_i32, %c0_i32_0 : i32, i32
  }
}

</mosaic_0001>

<bundles_post_ra>
// kernel: tpu_custom_call.1
= control target key start
LH: loop header
LB: loop body
LE: loop exit
PB: predicated region body
PF: predicated region fallthrough
CT: control target
= control target key end

     0   :  { %v2796_v2 = vmov 0   ;;  %s3940_s0 = inlined_call_operand.vmem [shape: bf16[256,384], index: 0, kind: input, shape index: {}]   ;;  %s3941_s1 = inlined_call_operand.vmem [shape: bf16[384,192], index: 1, kind: input, shape index: {}]   ;;  %s3942_s2 = inlined_call_operand.hbm [shape: f32[128,128], index: 2, kind: output, shape index: {}]  }
   0x1   :  { %v2508_v0 = vld [vmem:[%s3941_s1 + $0x4] ss:$8 sps:$4 sm:$0xff]   ;;  %v2510_v1 = vld [vmem:[%s3941_s1] ss:$8 sps:$4 sm:$0xff]   ;;  %926 = vmatprep.mubr.bf16.mxu1 %v2796_v2  ;;  %v2511_v3 = vld [vmem:[%s3941_s1 + $0x14] ss:$8 sps:$4 sm:$0xff]  }
   0x2   :  { %621 = vmatprep.subr.bf16.mxu0 %v2508_v0  ;;  %v2513_v4 = vld [vmem:[%s3941_s1 + $0x10] ss:$8 sps:$4 sm:$0xff]   ;;  %v2514_v5 = vld [vmem:[%s3941_s1 + $0x24] ss:$8 sps:$4 sm:$0xff]   ;;  %v2516_v6 = vld [vmem:[%s3941_s1 + $0x20] ss:$8 sps:$4 sm:$0xff]  }
   0x3   :  { %622 = vmatpush1.bf16.msra.mxu0 %v2510_v1  ;;  %v2517_v7 = vld [vmem:[%s3941_s1 + $0x34] ss:$8 sps:$4 sm:$0xff]   ;;  %v2519_v8 = vld [vmem:[%s3941_s1 + $0x30] ss:$8 sps:$4 sm:$0xff]   ;;  %v2520_v9 = vld [vmem:[%s3941_s1 + $0x44] ss:$8 sps:$4 sm:$0xff]  }
   0x4   :  { %623 = vmatprep.subr.bf16.mxu0 %v2511_v3  ;;  %v2522_v10 = vld [vmem:[%s3941_s1 + $0x40] ss:$8 sps:$4 sm:$0xff]   ;;  %v2523_v11 = vld [vmem:[%s3941_s1 + $0x54] ss:$8 sps:$4 sm:$0xff]   ;;  %v2525_v12 = vld [vmem:[%s3941_s1 + $0x50] ss:$8 sps:$4 sm:$0xff]  }
   0x5   :  { %v2526_v13 = vld [vmem:[%s3941_s1 + $0x64] ss:$8 sps:$4 sm:$0xff]   ;;  %v2528_v14 = vld [vmem:[%s3941_s1 + $0x60] ss:$8 sps:$4 sm:$0xff]   ;;  %v2529_v18 = vld [vmem:[%s3941_s1 + $0x74] ss:$8 sps:$4 sm:$0xff]  }
   0x6   :  { %v2558_v15 = vld [vmem:[%s3940_s0 + $0x4] ss:$12 sps:$4 sm:$0xff]   ;;  %v2865_v16 = vld [vmem:[%s3941_s1 + $0x100] ss:$8 sps:$4 sm:$0xff]   ;;  %v2888_v21 = vld [vmem:[%s3941_s1 + $0x114] ss:$8 sps:$4 sm:$0xff]  }
   0x7   :  { %624 = vmatpush1.bf16.msra.mxu0 %v2513_v4  ;;  %v2870_v17 = vld [vmem:[%s3941_s1 + $0x104] ss:$8 sps:$4 sm:$0xff]   ;;  %653 = vmatprep.mubr.bf16.mxu0 %v2558_v15  ;;  %v2531_v19 = vld [vmem:[%s3941_s1 + $0x70] ss:$8 sps:$4 sm:$0xff]   ;;  %v2534_v23 = vld [vmem:[%s3941_s1 + $0x80] ss:$8 sps:$4 sm:$0xff]  }
   0x8   :  { %625 = vmatprep.subr.bf16.mxu0 %v2514_v5  ;;  %2407 = vmatprep.subr.bf16.mxu1 %v2870_v17  ;;  %v2883_v20 = vld [vmem:[%s3941_s1 + $0x110] ss:$8 sps:$4 sm:$0xff]   ;;  %v2532_v22 = vld [vmem:[%s3941_s1 + $0x84] ss:$8 sps:$4 sm:$0xff]   ;;  %v2901_v24 = vld [vmem:[%s3941_s1 + $0x120] ss:$8 sps:$4 sm:$0xff]  }
   0x9   :  { %2415 = vmatpush1.bf16.msra.mxu1 %v2865_v16  ;;  %v2906_v25 = vld [vmem:[%s3941_s1 + $0x124] ss:$8 sps:$4 sm:$0xff]   ;;  %v2535_v26 = vld [vmem:[%s3941_s1 + $0x94] ss:$8 sps:$4 sm:$0xff]   ;;  %v2921_v28 = vld [vmem:[%s3941_s1 + $0x130] ss:$8 sps:$4 sm:$0xff]  }
   0xa   :  { %2408 = vmatprep.subr.bf16.mxu1 %v2888_v21  ;;  %v2916_v27 = vld [vmem:[%s3941_s1 + $0x134] ss:$8 sps:$4 sm:$0xff]   ;;  %v2537_v29 = vld [vmem:[%s3941_s1 + $0x90] ss:$8 sps:$4 sm:$0xff]   ;;  %v2538_v30 = vld [vmem:[%s3941_s1 + $0xa4] ss:$8 sps:$4 sm:$0xff]  }
   0xb   :  { %626 = vmatpush1.bf16.msra.mxu0 %v2516_v6  ;;  %v2933_v31 = vld [vmem:[%s3941_s1 + $0x144] ss:$8 sps:$4 sm:$0xff]   ;;  %v2939_v32 = vld [vmem:[%s3941_s1 + $0x140] ss:$8 sps:$4 sm:$0xff]   ;;  %v2948_v34 = vld [vmem:[%s3941_s1 + $0x154] ss:$8 sps:$4 sm:$0xff]  }
   0xc   :  { %627 = vmatprep.subr.bf16.mxu0 %v2517_v7  ;;  %v2540_v33 = vld [vmem:[%s3941_s1 + $0xa0] ss:$8 sps:$4 sm:$0xff]   ;;  %v2541_v35 = vld [vmem:[%s3941_s1 + $0xb4] ss:$8 sps:$4 sm:$0xff]   ;;  %v2957_v36 = vld [vmem:[%s3941_s1 + $0x150] ss:$8 sps:$4 sm:$0xff]  }
   0xd   :  { %2416 = vmatpush1.bf16.msra.mxu1 %v2883_v20  ;;  %v2543_v37 = vld [vmem:[%s3941_s1 + $0xb0] ss:$8 sps:$4 sm:$0xff]   ;;  %v2966_v38 = vld [vmem:[%s3941_s1 + $0x164] ss:$8 sps:$4 sm:$0xff]   ;;  %v2546_v40 = vld [vmem:[%s3941_s1 + $0xc0] ss:$8 sps:$4 sm:$0xff]  }
   0xe   :  { %2409 = vmatprep.subr.bf16.mxu1 %v2906_v25  ;;  %v2544_v39 = vld [vmem:[%s3941_s1 + $0xc4] ss:$8 sps:$4 sm:$0xff]   ;;  %v2978_v41 = vld [vmem:[%s3941_s1 + $0x160] ss:$8 sps:$4 sm:$0xff]   ;;  %v2984_v42 = vld [vmem:[%s3941_s1 + $0x174] ss:$8 sps:$4 sm:$0xff]  }
   0xf   :  { %628 = vmatpush1.bf16.msra.mxu0 %v2519_v8  ;;  %v2547_v43 = vld [vmem:[%s3941_s1 + $0xd4] ss:$8 sps:$4 sm:$0xff]   ;;  %v2993_v44 = vld [vmem:[%s3941_s1 + $0x170] ss:$8 sps:$4 sm:$0xff]   ;;  %v2550_v46 = vld [vmem:[%s3941_s1 + $0xe4] ss:$8 sps:$4 sm:$0xff]  }
  0x10   :  { %629 = vmatprep.subr.bf16.mxu0 %v2520_v9  ;;  %v2549_v45 = vld [vmem:[%s3941_s1 + $0xd0] ss:$8 sps:$4 sm:$0xff]   ;;  %v2607_v47 = vld [vmem:[%s3940_s0 + $0xc8] ss:$12 sps:$4 sm:$0xff]   ;;  %v2556_v51 = vld [vmem:[%s3940_s0] ss:$12 sps:$4 sm:$0xff]  }
  0x11   :  { %2417 = vmatpush1.bf16.msra.mxu1 %v2901_v24  ;;  %v2552_v48 = vld [vmem:[%s3941_s1 + $0xe0] ss:$8 sps:$4 sm:$0xff]   ;;  %v2553_v49 = vld [vmem:[%s3941_s1 + $0xf4] ss:$8 sps:$4 sm:$0xff]   ;;  %v2555_v50 = vld [vmem:[%s3941_s1 + $0xf0] ss:$8 sps:$4 sm:$0xff]  }
  0x12   :  { %2410 = vmatprep.subr.bf16.mxu1 %v2916_v27  ;;  %v2611_v52 = vld [vmem:[%s3940_s0 + $0xe0] ss:$12 sps:$4 sm:$0xff]   ;;  %v2562_v53 = vld [vmem:[%s3940_s0 + $0x1c] ss:$12 sps:$4 sm:$0xff]  }
  0x13   :  { %630 = vmatpush1.bf16.msra.mxu0 %v2522_v10 }
  0x14   :  { %631 = vmatprep.subr.bf16.mxu0 %v2523_v11 }
  0x15   :  { %2418 = vmatpush1.bf16.msra.mxu1 %v2921_v28 }
  0x16   :  { %2411 = vmatprep.subr.bf16.mxu1 %v2933_v31 }
  0x17   :  { %632 = vmatpush1.bf16.msra.mxu0 %v2525_v12 }
  0x18   :  { %633 = vmatprep.subr.bf16.mxu0 %v2526_v13 }
  0x19   :  { %2419 = vmatpush1.bf16.msra.mxu1 %v2939_v32 }
  0x1a   :  { %2412 = vmatprep.subr.bf16.mxu1 %v2948_v34 }
  0x1b   :  { %634 = vmatpush1.bf16.msra.mxu0 %v2528_v14 }
  0x1c   :  { %635 = vmatprep.subr.bf16.mxu0 %v2529_v18 }
  0x1d   :  { %2420 = vmatpush1.bf16.msra.mxu1 %v2957_v36 }
  0x1e   :  { %2413 = vmatprep.subr.bf16.mxu1 %v2966_v38 }
  0x1f   :  { %636 = vmatpush1.bf16.msra.mxu0 %v2531_v19 }
  0x20   :  { %637 = vmatprep.subr.bf16.mxu0 %v2532_v22 }
  0x21   :  { %2421 = vmatpush1.bf16.msra.mxu1 %v2978_v41 }
  0x22   :  { %2414 = vmatprep.subr.bf16.mxu1 %v2984_v42 }
  0x23   :  { %638 = vmatpush1.bf16.msra.mxu0 %v2534_v23 }
  0x24   :  { %639 = vmatprep.subr.bf16.mxu0 %v2535_v26 }
  0x25   :  { %2422 = vmatpush1.bf16.msra.mxu1 %v2993_v44 }
  0x27   :  { %640 = vmatpush1.bf16.msra.mxu0 %v2537_v29 }
  0x28   :  { %641 = vmatprep.subr.bf16.mxu0 %v2538_v30  ;;  %927 = vmatmul.mubr.bf16.vlgmr.msra.gmra.mrb[0].mxu1 %v2607_v47 }
  0x29   :  { %936 = vmatprep.mubr.bf16.mxu1 %v2796_v2 }
  0x2b   :  { %642 = vmatpush1.bf16.msra.mxu0 %v2540_v33 }
  0x2c   :  { %643 = vmatprep.subr.bf16.mxu0 %v2541_v35 }
  0x2f   :  { %644 = vmatpush1.bf16.msra.mxu0 %v2543_v37 }
  0x30   :  { %645 = vmatprep.subr.bf16.mxu0 %v2544_v39  ;;  %937 = vmatmul.mubr.bf16.gmra.mrb[4].mxu1 %v2611_v52 }
  0x31   :  { %946 = vmatprep.mubr.bf16.mxu1 %v2796_v2 }
  0x33   :  { %646 = vmatpush1.bf16.msra.mxu0 %v2546_v40 }
  0x34   :  { %647 = vmatprep.subr.bf16.mxu0 %v2547_v43 }
  0x37   :  { %648 = vmatpush1.bf16.msra.mxu0 %v2549_v45 }
  0x38   :  { %649 = vmatprep.subr.bf16.mxu0 %v2550_v46 }
  0x3b   :  { %650 = vmatpush1.bf16.msra.mxu0 %v2552_v48 }
  0x3c   :  { %651 = vmatprep.subr.bf16.mxu0 %v2553_v49 }
  0x3f   :  { %652 = vmatpush1.bf16.msra.mxu0 %v2555_v50 }
  0x40   :  { %814 = vmatprep.subr.bf16.mxu0 %v2870_v17 }
  0x42   :  { %654 = vmatmul.mubr.bf16.vlgmr.msra.gmra.mrb[0].mxu0 %v2556_v51 }
  0x43   :  { %815 = vmatpush1.bf16.msra.mxu0 %v2865_v16  ;;  %663 = vmatprep.mubr.bf16.mxu0 %v2562_v53 }
  0x44   :  { %7 = vsyncpa [#allocation3], 0  ;;  %816 = vmatprep.subr.bf16.mxu0 %v2888_v21  ;;  %v2615_v54 = vld [vmem:[%s3940_s0 + $0xf8] ss:$12 sps:$4 sm:$0xff]   ;;  %v2565_v56 = vld [vmem:[%s3940_s0 + $0x34] ss:$12 sps:$4 sm:$0xff]  }
  0x45   :  { %v2564_v55 = vld [vmem:[%s3940_s0 + $0x18] ss:$12 sps:$4 sm:$0xff]   ;;  %947 = vmatmul.mubr.bf16.gmra.mrb[8].mxu1 %v2615_v54  ;;  %v2619_v57 = vld [vmem:[%s3940_s0 + $0x110] ss:$12 sps:$4 sm:$0xff]   ;;  %v2623_v60 = vld [vmem:[%s3940_s0 + $0x128] ss:$12 sps:$4 sm:$0xff]  }
  0x46   :  { %956 = vmatprep.mubr.bf16.mxu1 %v2796_v2  ;;  %v2567_v58 = vld [vmem:[%s3940_s0 + $0x30] ss:$12 sps:$4 sm:$0xff]   ;;  %v2571_v59 = vld [vmem:[%s3940_s0 + $0x4c] ss:$12 sps:$4 sm:$0xff]   ;;  %v2573_v61 = vld [vmem:[%s3940_s0 + $0x48] ss:$12 sps:$4 sm:$0xff]  }
  0x47   :  { %817 = vmatpush1.bf16.msra.mxu0 %v2883_v20  ;;  %v2574_v62 = vld [vmem:[%s3940_s0 + $0x64] ss:$12 sps:$4 sm:$0xff]   ;;  %v2627_v63 = vld [vmem:[%s3940_s0 + $0x140] ss:$12 sps:$4 sm:$0xff]   ;;  %v2580_v1 = vld [vmem:[%s3940_s0 + $0x7c] ss:$12 sps:$4 sm:$0xff]  }
  0x48   :  { %818 = vmatprep.subr.bf16.mxu0 %v2906_v25  ;;  %v2576_v0 = vld [vmem:[%s3940_s0 + $0x60] ss:$12 sps:$4 sm:$0xff]   ;;  %v2631_v3 = vld [vmem:[%s3940_s0 + $0x158] ss:$12 sps:$4 sm:$0xff]   ;;  %v2635_v6 = vld [vmem:[%s3940_s0 + $0x170] ss:$12 sps:$4 sm:$0xff]  }
  0x49   :  { %v2582_v4 = vld [vmem:[%s3940_s0 + $0x78] ss:$12 sps:$4 sm:$0xff]   ;;  %v2586_v5 = vld [vmem:[%s3940_s0 + $0x94] ss:$12 sps:$4 sm:$0xff]   ;;  %v2588_v7 = vld [vmem:[%s3940_s0 + $0x90] ss:$12 sps:$4 sm:$0xff]  }
  0x4a   :  { %664 = vmatmul.mubr.bf16.gmra.mrb[4].mxu0 %v2564_v55  ;;  %v2595_v8 = vld [vmem:[%s3940_s0 + $0xac] ss:$12 sps:$4 sm:$0xff]   ;;  %v2597_v9 = vld [vmem:[%s3940_s0 + $0xa8] ss:$12 sps:$4 sm:$0xff]   ;;  %v2604_v10 = vld [vmem:[%s3940_s0 + $0xc4] ss:$12 sps:$4 sm:$0xff]  }
  0x4b   :  { %673 = vmatprep.mubr.bf16.mxu0 %v2565_v56  ;;  %819 = vmatpush1.bf16.msra.mxu0 %v2901_v24  ;;  %v2606_v11 = vld [vmem:[%s3940_s0 + $0xc0] ss:$12 sps:$4 sm:$0xff]   ;;  %v2608_v12 = vld [vmem:[%s3940_s0 + $0xdc] ss:$12 sps:$4 sm:$0xff]   ;;  %v2610_v13 = vld [vmem:[%s3940_s0 + $0xd8] ss:$12 sps:$4 sm:$0xff]  }
  0x4c   :  { %820 = vmatprep.subr.bf16.mxu0 %v2916_v27  ;;  %v2612_v14 = vld [vmem:[%s3940_s0 + $0xf4] ss:$12 sps:$4 sm:$0xff]   ;;  %v2614_v15 = vld [vmem:[%s3940_s0 + $0xf0] ss:$12 sps:$4 sm:$0xff]   ;;  %v2616_v16 = vld [vmem:[%s3940_s0 + $0x10c] ss:$12 sps:$4 sm:$0xff]  }
  0x4d   :  { %957 = vmatmul.mubr.bf16.gmra.mrb[12].mxu1 %v2619_v57  ;;  %v2618_v17 = vld [vmem:[%s3940_s0 + $0x108] ss:$12 sps:$4 sm:$0xff]   ;;  %v2620_v18 = vld [vmem:[%s3940_s0 + $0x124] ss:$12 sps:$4 sm:$0xff]   ;;  %v2622_v19 = vld [vmem:[%s3940_s0 + $0x120] ss:$12 sps:$4 sm:$0xff]  }
  0x4e   :  { %966 = vmatprep.mubr.bf16.mxu1 %v2796_v2  ;;  %v2624_v20 = vld [vmem:[%s3940_s0 + $0x13c] ss:$12 sps:$4 sm:$0xff]   ;;  %v2626_v21 = vld [vmem:[%s3940_s0 + $0x138] ss:$12 sps:$4 sm:$0xff]   ;;  %v2628_v22 = vld [vmem:[%s3940_s0 + $0x154] ss:$12 sps:$4 sm:$0xff]  }
  0x4f   :  { %821 = vmatpush1.bf16.msra.mxu0 %v2921_v28  ;;  %v2630_v23 = vld [vmem:[%s3940_s0 + $0x150] ss:$12 sps:$4 sm:$0xff]   ;;  %v2632_v24 = vld [vmem:[%s3940_s0 + $0x16c] ss:$12 sps:$4 sm:$0xff]   ;;  %v2634_v25 = vld [vmem:[%s3940_s0 + $0x168] ss:$12 sps:$4 sm:$0xff]  }
  0x50   :  { %822 = vmatprep.subr.bf16.mxu0 %v2933_v31  ;;  %v2636_v26 = vld [vmem:[%s3940_s0 + $0x8] ss:$12 sps:$4 sm:$0xff]   ;;  %v2637_v27 = vld [vmem:[%s3940_s0 + $0x20] ss:$12 sps:$4 sm:$0xff]   ;;  %v2638_v28 = vld [vmem:[%s3940_s0 + $0x38] ss:$12 sps:$4 sm:$0xff]  }
  0x51   :  { %v2639_v29 = vld [vmem:[%s3940_s0 + $0x50] ss:$12 sps:$4 sm:$0xff]   ;;  %v2640_v30 = vld [vmem:[%s3940_s0 + $0x68] ss:$12 sps:$4 sm:$0xff]   ;;  %v2641_v31 = vld [vmem:[%s3940_s0 + $0x80] ss:$12 sps:$4 sm:$0xff]  }
  0x52   :  { %674 = vmatmul.mubr.bf16.gmra.mrb[8].mxu0 %v2567_v58  ;;  %v2643_v33 = vld [vmem:[%s3940_s0 + $0xb0] ss:$12 sps:$4 sm:$0xff]   ;;  %vm1098_vm0 = vcmask 523264   ;;  %s2798_s30 = smov [#allocation2]  }
  0x53   :  { %683 = vmatprep.mubr.bf16.mxu0 %v2571_v59  ;;  %823 = vmatpush1.bf16.msra.mxu0 %v2939_v32  ;;  %v2642_v32 = vld [vmem:[%s3940_s0 + $0x98] ss:$12 sps:$4 sm:$0xff]   ;;  %s2797_s0 = smov 64   ;;  %s2092_s1 = sshll.u32 %s2798_s30, 4  ;;  %s2093_s1 = int_to_ptr.vmem [resolvable:$true] %s2092_s1 }
  0x54   :  { %824 = vmatprep.subr.bf16.mxu0 %v2948_v34  ;;  %s2772_s3 = scalar_lea.vmem %s2093_s1, 2048  ;;  %p2777_p1 = scmp.lt.s32.totalorder %s2093_s1, %s2093_s1 }
  0x55   :  { %967 = vmatmul.mubr.bf16.gmra.mrb[16].mxu1 %v2623_v60  ;;  %p2773_p0 = scmp.ne.s32.totalorder %s2093_s1, %s2772_s3  ;;  %p2778_p2 = scmp.lt.s32.totalorder %s2772_s3, %s2772_s3 }
  0x56   :  { %976 = vmatprep.mubr.bf16.mxu1 %v2796_v2 }
  0x57   :  { %825 = vmatpush1.bf16.msra.mxu0 %v2957_v36  ;;  %p2779_p3 = por %p2778_p2, %p2777_p1 }
  0x58   :  { %826 = vmatprep.subr.bf16.mxu0 %v2966_v38 }
  0x59   :  { %p2780_p4 = pnand %p2779_p3, %p2773_p0 }
  0x5a   :  { %684 = vmatmul.mubr.bf16.gmra.mrb[12].mxu0 %v2573_v61 }
  0x5b   :  { %693 = vmatprep.mubr.bf16.mxu0 %v2574_v62  ;;  %827 = vmatpush1.bf16.msra.mxu0 %v2978_v41 }
  0x5c   :  { %828 = vmatprep.subr.bf16.mxu0 %v2984_v42 }
  0x5d   :  { %977 = vmatmul.mubr.bf16.gmra.mrb[20].mxu1 %v2627_v63 }
  0x5e   :  { %986 = vmatprep.mubr.bf16.mxu1 %v2796_v2 }
  0x5f   :  { %829 = vmatpush1.bf16.msra.mxu0 %v2993_v44 }
  0x62   :  { %694 = vmatmul.mubr.bf16.gmra.mrb[16].mxu0 %v2576_v0 }
  0x63   :  { %703 = vmatprep.mubr.bf16.mxu0 %v2580_v1 }
  0x65   :  { %987 = vmatmul.mubr.bf16.gmra.mrb[24].mxu1 %v2631_v3 }
  0x66   :  { %996 = vmatprep.mubr.bf16.mxu1 %v2796_v2 }
  0x6a   :  { %704 = vmatmul.mubr.bf16.gmra.mrb[20].mxu0 %v2582_v4 }
  0x6b   :  { %713 = vmatprep.mubr.bf16.mxu0 %v2586_v5 }
  0x6d   :  { %997 = vmatmul.mubr.bf16.gmra.mrb[28].mxu1 %v2635_v6 }
  0x72   :  { %714 = vmatmul.mubr.bf16.gmra.mrb[24].mxu0 %v2588_v7 }
  0x73   :  { %723 = vmatprep.mubr.bf16.mxu0 %v2595_v8 }
  0x7a   :  { %724 = vmatmul.mubr.bf16.gmra.mrb[28].mxu0 %v2597_v9 }
  0x7b   :  { %733 = vmatprep.mubr.bf16.mxu0 %v2604_v10 }
  0x82   :  { %734 = vmatmul.mubr.bf16.gmra.mrb[32].mxu0 %v2606_v11 }
  0x83   :  { %743 = vmatprep.mubr.bf16.mxu0 %v2608_v12 }
  0x8a   :  { %744 = vmatmul.mubr.bf16.gmra.mrb[36].mxu0 %v2610_v13 }
  0x8b   :  { %753 = vmatprep.mubr.bf16.mxu0 %v2612_v14 }
  0x92   :  { %754 = vmatmul.mubr.bf16.gmra.mrb[40].mxu0 %v2614_v15 }
  0x93   :  { %763 = vmatprep.mubr.bf16.mxu0 %v2616_v16 }
  0x9a   :  { %764 = vmatmul.mubr.bf16.gmra.mrb[44].mxu0 %v2618_v17 }
  0x9b   :  { %773 = vmatprep.mubr.bf16.mxu0 %v2620_v18 }
  0xa2   :  { %774 = vmatmul.mubr.bf16.gmra.mrb[48].mxu0 %v2622_v19 }
  0xa3   :  { %783 = vmatprep.mubr.bf16.mxu0 %v2624_v20 }
  0xaa   :  { %784 = vmatmul.mubr.bf16.gmra.mrb[52].mxu0 %v2626_v21 }
  0xab   :  { %793 = vmatprep.mubr.bf16.mxu0 %v2628_v22 }
  0xb2   :  { %794 = vmatmul.mubr.bf16.gmra.mrb[56].mxu0 %v2630_v23 }
  0xb3   :  { %803 = vmatprep.mubr.bf16.mxu0 %v2632_v24 }
  0xba   :  { %804 = vmatmul.mubr.bf16.gmra.mrb[60].mxu0 %v2634_v25 }
  0xbb   :  { %846 = vmatprep.mubr.bf16.mxu0 %v2796_v2 }
  0xc2   :  { %847 = vmatmul.mubr.bf16.vlgmr.msra.gmra.mrb[0].mxu0 %v2636_v26 }
  0xc3   :  { %856 = vmatprep.mubr.bf16.mxu0 %v2796_v2 }
  0xca   :  { %857 = vmatmul.mubr.bf16.gmra.mrb[4].mxu0 %v2637_v27 }
  0xcb   :  { %866 = vmatprep.mubr.bf16.mxu0 %v2796_v2 }
  0xd2   :  { %867 = vmatmul.mubr.bf16.gmra.mrb[8].mxu0 %v2638_v28 }
  0xd3   :  { %876 = vmatprep.mubr.bf16.mxu0 %v2796_v2 }
  0xda   :  { %877 = vmatmul.mubr.bf16.gmra.mrb[12].mxu0 %v2639_v29 }
  0xdb   :  { %886 = vmatprep.mubr.bf16.mxu0 %v2796_v2 }
  0xe2   :  { %887 = vmatmul.mubr.bf16.gmra.mrb[16].mxu0 %v2640_v30 }
  0xe3   :  { %896 = vmatprep.mubr.bf16.mxu0 %v2796_v2 }
  0xea   :  { %897 = vmatmul.mubr.bf16.gmra.mrb[20].mxu0 %v2641_v31 }
  0xeb   :  { %906 = vmatprep.mubr.bf16.mxu0 %v2796_v2 }
  0xf2   :  { %907 = vmatmul.mubr.bf16.gmra.mrb[24].mxu0 %v2642_v32 }
  0xf3   :  { %916 = vmatprep.mubr.bf16.mxu0 %v2796_v2 }
  0xfa   :  { %917 = vmatmul.mubr.bf16.gmra.mrb[28].mxu0 %v2643_v33 }
  0xfb   :  { %v928_v34 = vpop.f32.mrb[0].mxu1 }
  0xfc   :  { %v930_v35 = vpop.f32.mrb[1].mxu1 }
  0xfd   :  { %v932_v36 = vpop.f32.mrb[2].mxu1 }
  0xfe   :  { %v934_v37 = vpop.f32.mrb[3].mxu1 }
 0x103   :  { %v938_v38 = vpop.f32.mrb[4].mxu1 }
 0x104   :  { %v940_v39 = vpop.f32.mrb[5].mxu1 }
 0x105   :  { %v942_v40 = vpop.f32.mrb[6].mxu1 }
 0x106   :  { %v944_v41 = vpop.f32.mrb[7].mxu1 }
 0x118   :  { %v948_v42 = vpop.f32.mrb[8].mxu1 }
 0x119   :  { %v950_v43 = vpop.f32.mrb[9].mxu1 }
 0x11a   :  { %v952_v44 = vpop.f32.mrb[10].mxu1 }
 0x11b   :  { %v954_v45 = vpop.f32.mrb[11].mxu1 }
 0x120   :  { %v958_v46 = vpop.f32.mrb[12].mxu1 }
 0x121   :  { %v960_v47 = vpop.f32.mrb[13].mxu1 }
 0x122   :  { %v962_v2 = vpop.f32.mrb[14].mxu1 }
 0x123   :  { %v3184_v48 = vpop.f32.mrb[15].mxu1 }
 0x128   :  { %v3186_v49 = vpop.f32.mrb[16].mxu1 }
 0x129   :  { %v3188_v50 = vpop.f32.mrb[17].mxu1 }
 0x12a   :  { %v3190_v51 = vpop.f32.mrb[18].mxu1 }
 0x12b   :  { %v3192_v52 = vpop.f32.mrb[19].mxu1 }
 0x130   :  { %v3194_v53 = vpop.f32.mrb[20].mxu1 }
 0x131   :  { %v3196_v54 = vpop.f32.mrb[21].mxu1 }
 0x132   :  { %v3198_v55 = vpop.f32.mrb[22].mxu1 }
 0x133   :  { %v3200_v56 = vpop.f32.mrb[23].mxu1 }
 0x138   :  { %v3202_v57 = vpop.f32.mrb[24].mxu1 }
 0x139   :  { %v3204_v58 = vpop.f32.mrb[25].mxu1 }
 0x13a   :  { %v3206_v59 = vpop.f32.mrb[26].mxu1 }
 0x13b   :  { %v3208_v60 = vpop.f32.mrb[27].mxu1 }
 0x140   :  { %v3210_v61 = vpop.f32.mrb[28].mxu1 }
 0x141   :  { %v3212_v62 = vpop.f32.mrb[29].mxu1 }
 0x142   :  { %v3214_v63 = vpop.f32.mrb[30].mxu1 }
 0x143   :  { %v3216_v0 = vpop.f32.mrb[31].mxu1 }
 0x155   :  { %v735_v1 = vpop.f32.mrb[32].mxu0 }
 0x156   :  { %v929_v3 = vadd.f32 %v928_v34, %v735_v1  ;;  %v737_v4 = vpop.f32.mrb[33].mxu0 }
 0x157   :  { %v931_v5 = vadd.f32 %v930_v35, %v737_v4  ;;  %v739_v6 = vpop.f32.mrb[34].mxu0 }
 0x158   :  { %v933_v7 = vadd.f32 %v932_v36, %v739_v6  ;;  %v741_v8 = vpop.f32.mrb[35].mxu0  ;;  %v3218_v10 = vmul.f32 0.05103104, %v929_v3 }
 0x159   :  { %v935_v9 = vadd.f32 %v934_v37, %v741_v8 }
 0x15a   :  { %v3220_v11 = vmul.f32 0.05103104, %v933_v7  ;;  %v3222_v12 = vpack.c.bf16 %v933_v7, %v929_v3 }
 0x15b   :  { %v3224_v13 = vpack.c.bf16 %v935_v9, %v931_v5 }
 0x15d   :  { %v745_v15 = vpop.f32.mrb[36].mxu0 }
 0x15e   :  { %v939_v16 = vadd.f32 %v938_v38, %v745_v15  ;;  %v747_v17 = vpop.f32.mrb[37].mxu0 }
 0x15f   :  { %v941_v18 = vadd.f32 %v940_v39, %v747_v17  ;;  %v749_v19 = vpop.f32.mrb[38].mxu0 }
 0x160   :  { %v943_v20 = vadd.f32 %v942_v40, %v749_v19  ;;  %v751_v21 = vpop.f32.mrb[39].mxu0  ;;  %v3228_v23 = vmul.f32 0.05103104, %v939_v16 }
 0x161   :  { %v945_v22 = vadd.f32 %v944_v41, %v751_v21 }
 0x162   :  { %v3230_v24 = vmul.f32 0.05103104, %v943_v20  ;;  %v3232_v25 = vpack.c.bf16 %v943_v20, %v939_v16 }
 0x163   :  { %v3234_v26 = vpack.c.bf16 %v945_v22, %v941_v18 }
 0x165   :  { %v755_v28 = vpop.f32.mrb[40].mxu0 }
 0x166   :  { %v949_v29 = vadd.f32 %v948_v42, %v755_v28  ;;  %v757_v30 = vpop.f32.mrb[41].mxu0 }
 0x167   :  { %v951_v31 = vadd.f32 %v950_v43, %v757_v30  ;;  %v759_v32 = vpop.f32.mrb[42].mxu0 }
 0x168   :  { %v953_v33 = vadd.f32 %v952_v44, %v759_v32  ;;  %v761_v34 = vpop.f32.mrb[43].mxu0  ;;  %v3238_v36 = vmul.f32 0.05103104, %v949_v29 }
 0x169   :  { %v955_v35 = vadd.f32 %v954_v45, %v761_v34 }
 0x16a   :  { %v3240_v37 = vmul.f32 0.05103104, %v953_v33  ;;  %v3242_v38 = vpack.c.bf16 %v953_v33, %v949_v29 }
 0x16b   :  { %v3244_v39 = vpack.c.bf16 %v955_v35, %v951_v31 }
 0x16d   :  { %v765_v41 = vpop.f32.mrb[44].mxu0 }
 0x16e   :  { %v959_v1 = vadd.f32 %v958_v46, %v765_v41  ;;  %v767_v42 = vpop.f32.mrb[45].mxu0 }
 0x16f   :  { %v961_v3 = vadd.f32 %v960_v47, %v767_v42  ;;  %v769_v43 = vpop.f32.mrb[46].mxu0 }
 0x170   :  { %v963_v4 = vadd.f32 %v962_v2, %v769_v43  ;;  %v771_v44 = vpop.f32.mrb[47].mxu0  ;;  %v3249_v5 = vmul.f32 0.05103104, %v959_v1 }
 0x171   :  { %v965_v45 = vadd.f32 %v3184_v48, %v771_v44 }
 0x172   :  { %v3251_v6 = vmul.f32 0.05103104, %v963_v4  ;;  %v3253_v7 = vpack.c.bf16 %v963_v4, %v959_v1 }
 0x173   :  { %v3255_v8 = vpack.c.bf16 %v965_v45, %v961_v3 }
 0x175   :  { %v775_v15 = vpop.f32.mrb[48].mxu0 }
 0x176   :  { %v969_v46 = vadd.f32 %v3186_v49, %v775_v15  ;;  %v777_v47 = vpop.f32.mrb[49].mxu0 }
 0x177   :  { %v971_v2 = vadd.f32 %v3188_v50, %v777_v47  ;;  %v779_v16 = vpop.f32.mrb[50].mxu0 }
 0x178   :  { %v973_v48 = vadd.f32 %v3190_v51, %v779_v16  ;;  %v781_v17 = vpop.f32.mrb[51].mxu0  ;;  %v3263_v19 = vmul.f32 0.05103104, %v969_v46 }
 0x179   :  { %v975_v18 = vadd.f32 %v3192_v52, %v781_v17 }
 0x17a   :  { %v3265_v20 = vmul.f32 0.05103104, %v973_v48  ;;  %v3267_v21 = vpack.c.bf16 %v973_v48, %v969_v46 }
 0x17b   :  { %v3269_v22 = vpack.c.bf16 %v975_v18, %v971_v2 }
 0x17d   :  { %v785_v28 = vpop.f32.mrb[52].mxu0 }
 0x17e   :  { %v979_v50 = vadd.f32 %v3194_v53, %v785_v28  ;;  %v787_v29 = vpop.f32.mrb[53].mxu0 }
 0x17f   :  { %v981_v51 = vadd.f32 %v3196_v54, %v787_v29  ;;  %v789_v30 = vpop.f32.mrb[54].mxu0 }
 0x180   :  { %v983_v52 = vadd.f32 %v3198_v55, %v789_v30  ;;  %v791_v31 = vpop.f32.mrb[55].mxu0  ;;  %v3277_v33 = vmul.f32 0.05103104, %v979_v50 }
 0x181   :  { %v985_v32 = vadd.f32 %v3200_v56, %v791_v31 }
 0x182   :  { %v3279_v34 = vmul.f32 0.05103104, %v983_v52  ;;  %v3281_v35 = vpack.c.bf16 %v983_v52, %v979_v50 }
 0x183   :  { %v3283_v41 = vpack.c.bf16 %v985_v32, %v981_v51 }
 0x185   :  { %v795_v1 = vpop.f32.mrb[56].mxu0 }
 0x186   :  { %v989_v54 = vadd.f32 %v3202_v57, %v795_v1  ;;  %v797_v42 = vpop.f32.mrb[57].mxu0 }
 0x187   :  { %v991_v55 = vadd.f32 %v3204_v58, %v797_v42  ;;  %v799_v3 = vpop.f32.mrb[58].mxu0 }
 0x188   :  { %v993_v56 = vadd.f32 %v3206_v59, %v799_v3  ;;  %v801_v43 = vpop.f32.mrb[59].mxu0  ;;  %v3291_v44 = vmul.f32 0.05103104, %v989_v54 }
 0x189   :  { %v995_v4 = vadd.f32 %v3208_v60, %v801_v43 }
 0x18a   :  { %v3293_v45 = vmul.f32 0.05103104, %v993_v56  ;;  %v3295_v15 = vpack.c.bf16 %v993_v56, %v989_v54 }
 0x18b   :  { %v3297_v46 = vpack.c.bf16 %v995_v4, %v991_v55 }
 0x18d   :  { %v805_v47 = vpop.f32.mrb[60].mxu0 }
 0x18e   :  { %v999_v58 = vadd.f32 %v3210_v61, %v805_v47  ;;  %v807_v2 = vpop.f32.mrb[61].mxu0 }
 0x18f   :  { %v1001_v59 = vadd.f32 %v3212_v62, %v807_v2  ;;  %v809_v16 = vpop.f32.mrb[62].mxu0 }
 0x190   :  { %v1003_v60 = vadd.f32 %v3214_v63, %v809_v16  ;;  %v811_v48 = vpop.f32.mrb[63].mxu0  ;;  %v3305_v18 = vmul.f32 0.05103104, %v999_v58 }
 0x191   :  { %v1005_v17 = vadd.f32 %v3216_v0, %v811_v48 }
 0x192   :  { %v3307_v28 = vmul.f32 0.05103104, %v1003_v60  ;;  %v3309_v50 = vpack.c.bf16 %v1003_v60, %v999_v58 }
 0x193   :  { %v3311_v29 = vpack.c.bf16 %v1005_v17, %v1001_v59 }
 0x195   :  { %v848_v51 = vpop.f32.mrb[0].mxu0 }
 0x196   :  { %v850_v30 = vpop.f32.mrb[1].mxu0  ;;  %v1042_v52 = vmul.f32 0.05103104, %v848_v51 }
 0x197   :  { %v852_v62 = vpop.f32.mrb[2].mxu0 }
 0x198   :  { %v1043_v31 = vmul.f32 0.05103104, %v852_v62  ;;  %v1066_v63 = vpack.c.bf16 %v852_v62, %v848_v51  ;;  %v854_v32 = vpop.f32.mrb[3].mxu0 }
 0x199   :  { %v3315_v1 = vpack.c.bf16 %v854_v32, %v850_v30 }
 0x19a   :  { %2487 = vmatprep.subr.msk.bf16.mxu1 %vm1098_vm0, %v1066_v63  ;;  %v1124_v0 = vsel %vm1098_vm0, %v1066_v63, 0  ;;  %v1058_v54 = vpack.c.bf16 %v1043_v31, %v1042_v52 }
 0x19b   :  { %2280 = vmatpush3.bf16.xpose.msra.mxu1 %v1124_v0 }
 0x19c   :  { %1082 = vrot.lane.b32.xlu0 %v1058_v54, %s2797_s0 }
 0x19d   :  { %v858_v42 = vpop.f32.mrb[4].mxu0 }
 0x19e   :  { %v860_v55 = vpop.f32.mrb[5].mxu0  ;;  %v1044_v56 = vmul.f32 0.05103104, %v858_v42 }
 0x19f   :  { %v862_v3 = vpop.f32.mrb[6].mxu0 }
 0x1a0   :  { %v1045_v43 = vmul.f32 0.05103104, %v862_v3  ;;  %v1067_v4 = vpack.c.bf16 %v862_v3, %v858_v42  ;;  %v864_v47 = vpop.f32.mrb[7].mxu0 }
 0x1a1   :  { %v3320_v58 = vpack.c.bf16 %v864_v47, %v860_v55 }
 0x1a2   :  { %v1059_v2 = vpack.c.bf16 %v1045_v43, %v1044_v56  ;;  %2488 = vmatprep.subr.msk.bf16.mxu1 %vm1098_vm0, %v1067_v4  ;;  %v1127_v59 = vsel %vm1098_vm0, %v1067_v4, 0 }
 0x1a3   :  { %2282 = vmatpush3.bf16.xpose.msra.mxu1 %v1127_v59 }
 0x1a4   :  { %1084 = vrot.lane.b32.xlu0 %v1059_v2, %s2797_s0 }
 0x1a5   :  { %v868_v16 = vpop.f32.mrb[8].mxu0 }
 0x1a6   :  { %v870_v60 = vpop.f32.mrb[9].mxu0  ;;  %v1046_v17 = vmul.f32 0.05103104, %v868_v16 }
 0x1a7   :  { %v872_v48 = vpop.f32.mrb[10].mxu0 }
 0x1a8   :  { %v1047_v51 = vmul.f32 0.05103104, %v872_v48  ;;  %v1068_v30 = vpack.c.bf16 %v872_v48, %v868_v16  ;;  %v874_v62 = vpop.f32.mrb[11].mxu0 }
 0x1a9   :  { %v3325_v52 = vpack.c.bf16 %v874_v62, %v870_v60 }
 0x1aa   :  { %2489 = vmatprep.subr.msk.bf16.mxu1 %vm1098_vm0, %v1068_v30  ;;  %v1130_v31 = vsel %vm1098_vm0, %v1068_v30, 0  ;;  %v1060_v63 = vpack.c.bf16 %v1047_v51, %v1046_v17 }
 0x1ab   :  { %2284 = vmatpush3.bf16.xpose.msra.mxu1 %v1130_v31 }
 0x1ac   :  { %1086 = vrot.lane.b32.xlu1 %v1060_v63, %s2797_s0 }
 0x1ad   :  { %v878_v32 = vpop.f32.mrb[12].mxu0 }
 0x1ae   :  { %v880_v0 = vpop.f32.mrb[13].mxu0  ;;  %v1048_v42 = vmul.f32 0.05103104, %v878_v32 }
 0x1af   :  { %v882_v54 = vpop.f32.mrb[14].mxu0 }
 0x1b0   :  { %v1049_v55 = vmul.f32 0.05103104, %v882_v54  ;;  %v1069_v3 = vpack.c.bf16 %v882_v54, %v878_v32  ;;  %v884_v56 = vpop.f32.mrb[15].mxu0 }
 0x1b1   :  { %v3330_v43 = vpack.c.bf16 %v884_v56, %v880_v0 }
 0x1b2   :  { %v1061_v4 = vpack.c.bf16 %v1049_v55, %v1048_v42  ;;  %2490 = vmatprep.subr.msk.bf16.mxu1 %vm1098_vm0, %v1069_v3  ;;  %v1133_v47 = vsel %vm1098_vm0, %v1069_v3, 0 }
 0x1b3   :  { %2286 = vmatpush3.bf16.xpose.msra.mxu1 %v1133_v47 }
 0x1b4   :  { %1088 = vrot.lane.b32.xlu1 %v1061_v4, %s2797_s0 }
 0x1b5   :  { %v888_v2 = vpop.f32.mrb[16].mxu0 }
 0x1b6   :  { %v890_v59 = vpop.f32.mrb[17].mxu0  ;;  %v1050_v60 = vmul.f32 0.05103104, %v888_v2 }
 0x1b7   :  { %v892_v16 = vpop.f32.mrb[18].mxu0 }
 0x1b8   :  { %v1051_v48 = vmul.f32 0.05103104, %v892_v16  ;;  %v1070_v17 = vpack.c.bf16 %v892_v16, %v888_v2  ;;  %v894_v51 = vpop.f32.mrb[19].mxu0 }
 0x1b9   :  { %v1416_v30 = vpack.c.bf16 %v894_v51, %v890_v59 }
 0x1ba   :  { %v1062_v62 = vpack.c.bf16 %v1051_v48, %v1050_v60  ;;  %2491 = vmatprep.subr.msk.bf16.mxu1 %vm1098_vm0, %v1070_v17  ;;  %v1136_v31 = vsel %vm1098_vm0, %v1070_v17, 0 }
 0x1bb   :  { %2288 = vmatpush3.bf16.xpose.msra.mxu1 %v1136_v31 }
 0x1bc   :  { %1090 = vrot.lane.b32.xlu0 %v1062_v62, %s2797_s0 }
 0x1bd   :  { %v898_v63 = vpop.f32.mrb[20].mxu0 }
 0x1be   :  { %v900_v32 = vpop.f32.mrb[21].mxu0  ;;  %v1052_v54 = vmul.f32 0.05103104, %v898_v63 }
 0x1bf   :  { %v902_v0 = vpop.f32.mrb[22].mxu0 }
 0x1c0   :  { %v1053_v42 = vmul.f32 0.05103104, %v902_v0  ;;  %v1071_v55 = vpack.c.bf16 %v902_v0, %v898_v63  ;;  %v904_v3 = vpop.f32.mrb[23].mxu0 }
 0x1c1   :  { %v1417_v56 = vpack.c.bf16 %v904_v3, %v900_v32 }
 0x1c2   :  { %v1063_v4 = vpack.c.bf16 %v1053_v42, %v1052_v54  ;;  %2492 = vmatprep.subr.msk.bf16.mxu1 %vm1098_vm0, %v1071_v55  ;;  %v1139_v47 = vsel %vm1098_vm0, %v1071_v55, 0 }
 0x1c3   :  { %2290 = vmatpush3.bf16.xpose.msra.mxu1 %v1139_v47 }
 0x1c4   :  { %1092 = vrot.lane.b32.xlu1 %v1063_v4, %s2797_s0 }
 0x1c5   :  { %v908_v2 = vpop.f32.mrb[24].mxu0 }
 0x1c6   :  { %v910_v59 = vpop.f32.mrb[25].mxu0  ;;  %v1054_v60 = vmul.f32 0.05103104, %v908_v2 }
 0x1c7   :  { %v912_v16 = vpop.f32.mrb[26].mxu0 }
 0x1c8   :  { %v1055_v48 = vmul.f32 0.05103104, %v912_v16  ;;  %v1072_v17 = vpack.c.bf16 %v912_v16, %v908_v2  ;;  %v914_v51 = vpop.f32.mrb[27].mxu0 }
 0x1c9   :  { %v1418_v62 = vpack.c.bf16 %v914_v51, %v910_v59 }
 0x1ca   :  { %v1064_v31 = vpack.c.bf16 %v1055_v48, %v1054_v60  ;;  %2493 = vmatprep.subr.msk.bf16.mxu1 %vm1098_vm0, %v1072_v17  ;;  %v1142_v63 = vsel %vm1098_vm0, %v1072_v17, 0 }
 0x1cb   :  { %2292 = vmatpush3.bf16.xpose.msra.mxu1 %v1142_v63 }
 0x1cc   :  { %1094 = vrot.lane.b32.xlu0 %v1064_v31, %s2797_s0 }
 0x1cd   :  { %v918_v32 = vpop.f32.mrb[28].mxu0 }
 0x1ce   :  { %v920_v0 = vpop.f32.mrb[29].mxu0  ;;  %v1056_v42 = vmul.f32 0.05103104, %v918_v32 }
 0x1cf   :  { %v922_v54 = vpop.f32.mrb[30].mxu0 }
 0x1d0   :  { %v1057_v55 = vmul.f32 0.05103104, %v922_v54  ;;  %v1073_v3 = vpack.c.bf16 %v922_v54, %v918_v32  ;;  %v924_v4 = vpop.f32.mrb[31].mxu0 }
 0x1d1   :  { %v1419_v47 = vpack.c.bf16 %v924_v4, %v920_v0 }
 0x1d2   :  { %v1065_v61 = vpack.c.bf16 %v1057_v55, %v1056_v42  ;;  %2494 = vmatprep.subr.msk.bf16.mxu1 %vm1098_vm0, %v1073_v3  ;;  %v1145_v2 = vsel %vm1098_vm0, %v1073_v3, 0 }
 0x1d3   :  { %2294 = vmatpush3.bf16.xpose.msra.mxu1 %v1145_v2 }
 0x1d4   :  { %2311 = vmatprep.subr.bf16.mxu1 %v3315_v1  ;;  %1096 = vrot.lane.b32.xlu1 %v1065_v61, %s2797_s0 }
 0x20e   :  { %v1083_v59 = vpop.permute.xlu0 %1082 }
 0x20f   :  { %2295 = vmatprep.mubr.msk.bf16.mxu1 %vm1098_vm0, %v1083_v59 }
 0x216   :  { %v1085_v16 = vpop.permute.xlu0 %1084 }
 0x217   :  { %2296 = vmatmul.mubr.msk.bf16.vlgmr.msra.gmra.mrb[32].mxu1 %vm1098_vm0, %v1085_v16 }
 0x218   :  { %2312 = vmatpush3.bf16.msra.mxu1 %v3315_v1 }
 0x219   :  { %2313 = vmatprep.subr.bf16.mxu1 %v3320_v58 }
 0x21c   :  { %2314 = vmatpush3.bf16.msra.mxu1 %v3320_v58 }
 0x21d   :  { %2315 = vmatprep.subr.bf16.mxu1 %v3325_v52 }
 0x21e   :  { %v1087_v60 = vpop.permute.xlu1 %1086 }
 0x21f   :  { %2299 = vmatprep.mubr.msk.bf16.mxu1 %vm1098_vm0, %v1087_v60 }
 0x220   :  { %2316 = vmatpush3.bf16.msra.mxu1 %v3325_v52 }
 0x221   :  { %2317 = vmatprep.subr.bf16.mxu1 %v3330_v43 }
 0x224   :  { %2318 = vmatpush3.bf16.msra.mxu1 %v3330_v43 }
 0x225   :  { %2319 = vmatprep.subr.bf16.mxu1 %v1416_v30 }
 0x226   :  { %v1089_v61 = vpop.permute.xlu1 %1088 }
 0x227   :  { %2300 = vmatmul.mubr.msk.bf16.gmra.mrb[36].mxu1 %vm1098_vm0, %v1089_v61 }
 0x228   :  { %2320 = vmatpush3.bf16.msra.mxu1 %v1416_v30  ;;  %v1007_v30 = vlaneseq }
 0x229   :  { %2321 = vmatprep.subr.bf16.mxu1 %v1417_v56 }
 0x22a   :  { %v3367_v48 = vand.u32 127, %v1007_v30 }
 0x22c   :  { %2322 = vmatpush3.bf16.msra.mxu1 %v1417_v56  ;;  %v3365_v56 = vshrl.u32 %v1007_v30, 7 }
 0x22d   :  { %2323 = vmatprep.subr.bf16.mxu1 %v1418_v62 }
 0x22e   :  { %v1091_v1 = vpop.permute.xlu0 %1090  ;;  %v3370_v17 = vadd.s32 8, %v3365_v56  ;;  %vm1026_vm1 = vcmp.le.s32.totalorder %v3367_v48, %v3365_v56  ;;  %v3375_v51 = vadd.s32 16, %v3365_v56  ;;  %v3388_v54 = vadd.s32 24, %v3365_v56 }
 0x22f   :  { %2303 = vmatprep.mubr.msk.bf16.mxu1 %vm1098_vm0, %v1091_v1  ;;  %v3411_v4 = vadd.s32 32, %v3365_v56  ;;  %v3419_v2 = vadd.s32 48, %v3365_v56  ;;  %v3424_v60 = vadd.s32 56, %v3365_v56  ;;  %v3502_v9 = vadd.s32 104, %v3365_v56 }
 0x230   :  { %2324 = vmatpush3.bf16.msra.mxu1 %v1418_v62  ;;  %3958 = vst [vmem:[#allocation5_spill] sm:$0xff] %v3375_v51  ;;  %vm1027_vm2 = vcmp.le.s32.totalorder %v3367_v48, %v3370_v17  ;;  %vm1028_vm3 = vcmp.le.s32.totalorder %v3367_v48, %v3375_v51  ;;  %3959 = vst [vmem:[#allocation6_spill] sm:$0xff] %v3388_v54  ;;  %vm1029_vm4 = vcmp.le.s32.totalorder %v3367_v48, %v3388_v54 }
 0x231   :  { %2325 = vmatprep.subr.bf16.mxu1 %v1419_v47  ;;  %3960 = vst [vmem:[#allocation7_spill] sm:$0xff] %v3411_v4  ;;  %vm1030_vm5 = vcmp.le.s32.totalorder %v3367_v48, %v3411_v4  ;;  %3962 = vst [vmem:[#allocation9_spill] sm:$0xff] %v3419_v2  ;;  %vm1032_vm7 = vcmp.le.s32.totalorder %v3367_v48, %v3419_v2  ;;  %vm1033_vm8 = vcmp.le.s32.totalorder %v3367_v48, %v3424_v60 }
 0x232   :  { %3963 = vst [vmem:[#allocation10_spill] sm:$0xff] %v3424_v60  ;;  %3969 = vst [vmem:[#allocation16_spill] sm:$0xff] %v3502_v9  ;;  %vm1039_vm14 = vcmp.le.s32.totalorder %v3367_v48, %v3502_v9 }
 0x234   :  { %2326 = vmatpush3.bf16.msra.mxu1 %v1419_v47  ;;  %v3414_v47 = vadd.s32 40, %v3365_v56 }
 0x235   :  { %2495 = vmatprep.subr.msk.bf16.mxu1 %vm1098_vm0, %v3222_v12 }
 0x236   :  { %v1093_v58 = vpop.permute.xlu1 %1092  ;;  %3961 = vst [vmem:[#allocation8_spill] sm:$0xff] %v3414_v47  ;;  %vm1031_vm6 = vcmp.le.s32.totalorder %v3367_v48, %v3414_v47 }
 0x237   :  { %2304 = vmatmul.mubr.msk.bf16.gmra.mrb[40].mxu1 %vm1098_vm0, %v1093_v58 }
 0x23e   :  { %v1095_v52 = vpop.permute.xlu0 %1094 }
 0x23f   :  { %2307 = vmatprep.mubr.msk.bf16.mxu1 %vm1098_vm0, %v1095_v52 }
 0x246   :  { %v1097_v43 = vpop.permute.xlu1 %1096 }
 0x247   :  { %2308 = vmatmul.mubr.msk.bf16.gmra.mrb[44].mxu1 %vm1098_vm0, %v1097_v43 }
 0x2ea   :  { %v2297_v62 = vpop.f32.mrb[32].mxu1 }
 0x2eb   :  { %v1181_v31 = vpop.f32.mrb[33].mxu1  ;;  %v3399_v55 = vsel %vm1028_vm3, %v2297_v62, -inf  ;;  %v3455_v62 = vadd.s32 64, %v3365_v56 }
 0x2ec   :  { %v2298_v63 = vpop.f32.mrb[34].mxu1  ;;  %v3382_v32 = vsel %vm1026_vm1, %v1181_v31, -inf  ;;  %v3458_v31 = vadd.s32 72, %v3365_v56 }
 0x2ed   :  { %1260 = vmax.xlane.f32.xlu0 %v3382_v32  ;;  %v1184_v0 = vpop.f32.mrb[35].mxu1  ;;  %v3407_v3 = vsel %vm1029_vm4, %v2298_v63, -inf  ;;  %3964 = vst [vmem:[#allocation11_spill] sm:$0xff] %v3455_v62  ;;  %vm1034_vm9 = vcmp.le.s32.totalorder %v3367_v48, %v3455_v62  ;;  %v3463_v63 = vadd.s32 80, %v3365_v56 }
 0x2ee   :  { %v3393_v42 = vsel %vm1027_vm2, %v1184_v0, -inf  ;;  %3965 = vst [vmem:[#allocation12_spill] sm:$0xff] %v3458_v31  ;;  %vm1035_vm10 = vcmp.le.s32.totalorder %v3367_v48, %v3458_v31 }
 0x2ef   :  { %1262 = vmax.xlane.f32.xlu1 %v3393_v42  ;;  %3966 = vst [vmem:[#allocation13_spill] sm:$0xff] %v3463_v63  ;;  %vm1036_vm11 = vcmp.le.s32.totalorder %v3367_v48, %v3463_v63 }
 0x2f1   :  { %1264 = vmax.xlane.f32.xlu0 %v3399_v55 }
 0x2f5   :  { %1266 = vmax.xlane.f32.xlu0 %v3407_v3 }
 0x2fa   :  { %v2301_v59 = vpop.f32.mrb[36].mxu1 }
 0x2fb   :  { %v1197_v16 = vpop.f32.mrb[37].mxu1  ;;  %v3445_v43 = vsel %vm1032_vm7, %v2301_v59, -inf }
 0x2fc   :  { %v2302_v61 = vpop.f32.mrb[38].mxu1  ;;  %v3429_v1 = vsel %vm1030_vm5, %v1197_v16, -inf  ;;  %v3468_v16 = vadd.s32 88, %v3365_v56 }
 0x2fd   :  { %v1200_v58 = vpop.f32.mrb[39].mxu1  ;;  %1268 = vmax.xlane.f32.xlu1 %v3429_v1  ;;  %v3451_v30 = vsel %vm1033_vm8, %v2302_v61, -inf }
 0x2fe   :  { %v3437_v52 = vsel %vm1031_vm6, %v1200_v58, -inf  ;;  %3967 = vst [vmem:[#allocation14_spill] sm:$0xff] %v3468_v16  ;;  %vm3946_vm12 = vcmp.le.s32.totalorder %v3367_v48, %v3468_v16 }
 0x2ff   :  { %1270 = vmax.xlane.f32.xlu0 %v3437_v52 }
 0x301   :  { %1272 = vmax.xlane.f32.xlu1 %v3445_v43 }
 0x303   :  { %1274 = vmax.xlane.f32.xlu0 %v3451_v30 }
 0x30a   :  { %v2305_v0 = vpop.f32.mrb[40].mxu1 }
 0x30b   :  { %v1213_v59 = vpop.f32.mrb[41].mxu1 }
 0x30c   :  { %v2306_v61 = vpop.f32.mrb[42].mxu1  ;;  %v3473_v58 = vsel %vm1034_vm9, %v1213_v59, -inf  ;;  %v3489_v59 = vsel %vm1036_vm11, %v2305_v0, -inf  ;;  %v3507_v0 = vadd.s32 112, %v3365_v56 }
 0x30d   :  { %v1216_v57 = vpop.f32.mrb[43].mxu1  ;;  %1276 = vmax.xlane.f32.xlu1 %v3473_v58  ;;  %v3495_v49 = vsel %vm3946_vm12, %v2306_v61, -inf  ;;  %v3512_v61 = vadd.s32 120, %v3365_v56 }
 0x30e   :  { %v3481_v53 = vsel %vm1035_vm10, %v1216_v57, -inf  ;;  %v3499_v57 = vadd.s32 96, %v3365_v56  ;;  %3970 = vst [vmem:[#allocation17_spill] sm:$0xff] %v3507_v0  ;;  %vm1040_vm15 = vcmp.le.s32.totalorder %v3367_v48, %v3507_v0 }
 0x30f   :  { %1278 = vmax.xlane.f32.xlu0 %v3481_v53  ;;  %3971 = vst [vmem:[#allocation18_spill] sm:$0xff] %v3512_v61  ;;  %vm1041_vm12 = vcmp.le.s32.totalorder %v3367_v48, %v3512_v61 }
 0x310   :  { %3968 = vst [vmem:[#allocation15_spill] sm:$0xff] %v3499_v57  ;;  %vm1038_vm13 = vcmp.le.s32.totalorder %v3367_v48, %v3499_v57 }
 0x311   :  { %1280 = vmax.xlane.f32.xlu1 %v3489_v59 }
 0x313   :  { %1282 = vmax.xlane.f32.xlu0 %v3495_v49 }
 0x31a   :  { %v2309_v27 = vpop.f32.mrb[44].mxu1 }
 0x31b   :  { %v1229_v40 = vpop.f32.mrb[45].mxu1 }
 0x31c   :  { %v2310_v14 = vpop.f32.mrb[46].mxu1  ;;  %v3517_v16 = vsel %vm1038_vm13, %v1229_v40, -inf  ;;  %v3533_v40 = vsel %vm1040_vm15, %v2309_v27, -inf }
 0x31d   :  { %1284 = vmax.xlane.f32.xlu1 %v3517_v16  ;;  %v1232_v31 = vpop.f32.mrb[47].mxu1  ;;  %v3539_v57 = vsel %vm1041_vm12, %v2310_v14, -inf }
 0x31e   :  { %v3525_v63 = vsel %vm1039_vm14, %v1232_v31, -inf }
 0x31f   :  { %1286 = vmax.xlane.f32.xlu0 %v3525_v63 }
 0x321   :  { %1288 = vmax.xlane.f32.xlu1 %v3533_v40 }
 0x323   :  { %1290 = vmax.xlane.f32.xlu0 %v3539_v57 }
 0x37a   :  { %v1261_v31 = vpop.xlane.xlu0 %1260 }
 0x37b   :  { %v1292_v9 = vsub.f32 %v3382_v32, %v1261_v31 }
 0x37c   :  { %v1263_v62 = vpop.xlane.xlu1 %1262 }
 0x37d   :  { %v1308_v60 = vmul.f32 1.442695, %v1292_v9  ;;  %v1293_v47 = vsub.f32 %v3393_v42, %v1263_v62 }
 0x37e   :  { %v1265_v2 = vpop.xlane.xlu0 %1264 }
 0x37f   :  { %2644 = vpow2.f32 %v1308_v60  ;;  %v1310_v27 = vmul.f32 1.442695, %v1293_v47  ;;  %v1294_v0 = vsub.f32 %v3399_v55, %v1265_v2 }
 0x381   :  { %2646 = vpow2.f32 %v1310_v27  ;;  %v1312_v4 = vmul.f32 1.442695, %v1294_v0 }
 0x382   :  { %v1267_v54 = vpop.xlane.xlu0 %1266 }
 0x383   :  { %2648 = vpow2.f32 %v1312_v4  ;;  %v1295_v14 = vsub.f32 %v3407_v3, %v1267_v54 }
 0x385   :  { %v1314_v61 = vmul.f32 1.442695, %v1295_v14 }
 0x387   :  { %2650 = vpow2.f32 %v1314_v61 }
 0x389   :  { %v3546_v51 = vpop.eup %2644 }
 0x38a   :  { %1340 = vadd.xlane.f32.xlu1 %v3546_v51  ;;  %v1269_v9 = vpop.xlane.xlu1 %1268 }
 0x38b   :  { %v3549_v32 = vpop.eup %2646  ;;  %v1296_v42 = vsub.f32 %v3429_v1, %v1269_v9 }
 0x38c   :  { %v1271_v47 = vpop.xlane.xlu0 %1270  ;;  %1342 = vadd.xlane.f32.xlu0 %v3549_v32 }
 0x38d   :  { %v3553_v55 = vpop.eup %2648  ;;  %v1316_v2 = vmul.f32 1.442695, %v1296_v42  ;;  %v1297_v4 = vsub.f32 %v3437_v52, %v1271_v47 }
 0x38e   :  { %1344 = vadd.xlane.f32.xlu1 %v3553_v55  ;;  %v1273_v54 = vpop.xlane.xlu1 %1272 }
 0x38f   :  { %2652 = vpow2.f32 %v1316_v2  ;;  %v1318_v3 = vmul.f32 1.442695, %v1297_v4  ;;  %v1298_v60 = vsub.f32 %v3445_v43, %v1273_v54 }
 0x390   :  { %v1275_v62 = vpop.xlane.xlu0 %1274 }
 0x391   :  { %v3558_v0 = vpop.eup %2650  ;;  %2654 = vpow2.f32 %v1318_v3  ;;  %v1320_v1 = vmul.f32 1.442695, %v1298_v60  ;;  %v1299_v61 = vsub.f32 %v3451_v30, %v1275_v62 }
 0x392   :  { %1346 = vadd.xlane.f32.xlu0 %v3558_v0 }
 0x393   :  { %2656 = vpow2.f32 %v1320_v1  ;;  %v1322_v31 = vmul.f32 1.442695, %v1299_v61 }
 0x395   :  { %2658 = vpow2.f32 %v1322_v31 }
 0x399   :  { %v3562_v52 = vpop.eup %2652 }
 0x39a   :  { %1348 = vadd.xlane.f32.xlu1 %v3562_v52  ;;  %v1277_v27 = vpop.xlane.xlu1 %1276 }
 0x39b   :  { %v3565_v14 = vpop.eup %2654  ;;  %v1300_v43 = vsub.f32 %v3473_v58, %v1277_v27 }
 0x39c   :  { %v1279_v9 = vpop.xlane.xlu0 %1278  ;;  %1350 = vadd.xlane.f32.xlu0 %v3565_v14 }
 0x39d   :  { %v3569_v42 = vpop.eup %2656  ;;  %v1324_v30 = vmul.f32 1.442695, %v1300_v43  ;;  %v1301_v47 = vsub.f32 %v3481_v53, %v1279_v9 }
 0x39e   :  { %1352 = vadd.xlane.f32.xlu1 %v3569_v42  ;;  %v1281_v2 = vpop.xlane.xlu1 %1280 }
 0x39f   :  { %v3573_v4 = vpop.eup %2658  ;;  %2660 = vpow2.f32 %v1324_v30  ;;  %v1326_v54 = vmul.f32 1.442695, %v1301_v47  ;;  %v1302_v3 = vsub.f32 %v3489_v59, %v1281_v2 }
 0x3a0   :  { %v1283_v60 = vpop.xlane.xlu0 %1282  ;;  %1354 = vadd.xlane.f32.xlu0 %v3573_v4 }
 0x3a1   :  { %2662 = vpow2.f32 %v1326_v54  ;;  %v1328_v58 = vmul.f32 1.442695, %v1302_v3  ;;  %v1303_v62 = vsub.f32 %v3495_v49, %v1283_v60 }
 0x3a3   :  { %2664 = vpow2.f32 %v1328_v58  ;;  %v1330_v1 = vmul.f32 1.442695, %v1303_v62 }
 0x3a5   :  { %2666 = vpow2.f32 %v1330_v1 }
 0x3a9   :  { %v3578_v53 = vpop.eup %2660 }
 0x3aa   :  { %1356 = vadd.xlane.f32.xlu1 %v3578_v53  ;;  %v1285_v61 = vpop.xlane.xlu1 %1284 }
 0x3ab   :  { %v3581_v31 = vpop.eup %2662  ;;  %v1304_v27 = vsub.f32 %v3517_v16, %v1285_v61  ;;  %v3973_v61 = vpack.c.bf16 %v3240_v37, %v3238_v36 }
 0x3ac   :  { %v1287_v59 = vpop.xlane.xlu0 %1286  ;;  %1358 = vadd.xlane.f32.xlu0 %v3581_v31 }
 0x3ad   :  { %v3585_v43 = vpop.eup %2664  ;;  %v1332_v9 = vmul.f32 1.442695, %v1304_v27  ;;  %v1305_v49 = vsub.f32 %v3525_v63, %v1287_v59  ;;  %v3974_v27 = vpack.c.bf16 %v3230_v24, %v3228_v23  ;;  %v3975_v59 = vpack.c.bf16 %v3251_v6, %v3249_v5 }
 0x3ae   :  { %1360 = vadd.xlane.f32.xlu1 %v3585_v43  ;;  %v1289_v30 = vpop.xlane.xlu1 %1288  ;;  %v3978_v23 = vpack.c.bf16 %v3293_v45, %v3291_v44  ;;  %v3979_v24 = vpack.c.bf16 %v3307_v28, %v3305_v18 }
 0x3af   :  { %v3589_v47 = vpop.eup %2666  ;;  %2668 = vpow2.f32 %v1332_v9  ;;  %v1334_v2 = vmul.f32 1.442695, %v1305_v49  ;;  %v1306_v54 = vsub.f32 %v3533_v40, %v1289_v30 }
 0x3b0   :  { %v1291_v3 = vpop.xlane.xlu0 %1290  ;;  %1362 = vadd.xlane.f32.xlu0 %v3589_v47 }
 0x3b1   :  { %2670 = vpow2.f32 %v1334_v2  ;;  %v1336_v16 = vmul.f32 1.442695, %v1306_v54  ;;  %v1307_v60 = vsub.f32 %v3539_v57, %v1291_v3  ;;  %v3972_v57 = vpack.c.bf16 %v3220_v11, %v3218_v10 }
 0x3b2   :  { %v3976_v10 = vpack.c.bf16 %v3265_v20, %v3263_v19  ;;  %v3977_v11 = vpack.c.bf16 %v3279_v34, %v3277_v33 }
 0x3b3   :  { %2672 = vpow2.f32 %v1336_v16  ;;  %v1338_v58 = vmul.f32 1.442695, %v1307_v60 }
 0x3b5   :  { %2674 = vpow2.f32 %v1338_v58 }
 0x3b9   :  { %v3594_v63 = vpop.eup %2668 }
 0x3ba   :  { %1364 = vadd.xlane.f32.xlu1 %v3594_v63 }
 0x3bb   :  { %v3597_v62 = vpop.eup %2670 }
 0x3bc   :  { %1366 = vadd.xlane.f32.xlu0 %v3597_v62 }
 0x3bd   :  { %v3600_v1 = vpop.eup %2672 }
 0x3be   :  { %1368 = vadd.xlane.f32.xlu1 %v3600_v1 }
 0x3bf   :  { %v3603_v40 = vpop.eup %2674 }
 0x3c0   :  { %1370 = vadd.xlane.f32.xlu0 %v3603_v40 }
 0x3cf   :  { %1557 = vrot.lane.b32.xlu1 %v3972_v57, %s2797_s0  ;;  %v1601_v57 = vsel %vm1098_vm0, %v3232_v25, 0 }
 0x3d3   :  { %1561 = vrot.lane.b32.xlu1 %v3973_v61, %s2797_s0 }
 0x3d6   :  { %1559 = vrot.lane.b32.xlu0 %v3974_v27, %s2797_s0 }
 0x3d7   :  { %1563 = vrot.lane.b32.xlu1 %v3975_v59, %s2797_s0 }
 0x3da   :  { %1565 = vrot.lane.b32.xlu0 %v3976_v10, %s2797_s0 }
 0x3db   :  { %1567 = vrot.lane.b32.xlu1 %v3977_v11, %s2797_s0 }
 0x3de   :  { %1569 = vrot.lane.b32.xlu0 %v3978_v23, %s2797_s0 }
 0x3df   :  { %1571 = vrot.lane.b32.xlu1 %v3979_v24, %s2797_s0 }
 0x417   :  { %v1341_v36 = vpop.xlane.xlu1 %1340 }
 0x418   :  { %2676 = vrcp.f32 %v1341_v36 }
 0x419   :  { %v1343_v37 = vpop.xlane.xlu0 %1342 }
 0x41a   :  { %2678 = vrcp.f32 %v1343_v37 }
 0x41b   :  { %v1345_v5 = vpop.xlane.xlu1 %1344 }
 0x41c   :  { %2680 = vrcp.f32 %v1345_v5  ;;  %v1607_v5 = vsel %vm1098_vm0, %v3253_v7, 0 }
 0x41f   :  { %v1347_v6 = vpop.xlane.xlu0 %1346 }
 0x420   :  { %2682 = vrcp.f32 %v1347_v6 }
 0x422   :  { %v2677_v19 = vpop.eup %2676 }
 0x423   :  { %v1388_v33 = vmul.f32 %v2677_v19, %v3546_v51  ;;  %v1598_v51 = vsel %vm1098_vm0, %v3222_v12, 0 }
 0x424   :  { %v2679_v20 = vpop.eup %2678 }
 0x425   :  { %v1389_v34 = vmul.f32 %v2679_v20, %v3549_v32 }
 0x426   :  { %v2681_v9 = vpop.eup %2680 }
 0x427   :  { %v1349_v44 = vpop.xlane.xlu1 %1348  ;;  %v1404_v45 = vpack.c.bf16 %v1389_v34, %v1388_v33  ;;  %v1390_v49 = vmul.f32 %v2681_v9, %v3553_v55 }
 0x428   :  { %2684 = vrcp.f32 %v1349_v44 }
 0x429   :  { %v1351_v18 = vpop.xlane.xlu0 %1350  ;;  %2327 = vmatprep.mubr.bf16.mxu1 %v1404_v45 }
 0x42a   :  { %v2683_v28 = vpop.eup %2682  ;;  %2686 = vrcp.f32 %v1351_v18  ;;  %v1613_v18 = vsel %vm1098_vm0, %v3281_v35, 0 }
 0x42b   :  { %v1391_v30 = vmul.f32 %v2683_v28, %v3558_v0  ;;  %v1353_v2 = vpop.xlane.xlu1 %1352 }
 0x42c   :  { %2688 = vrcp.f32 %v1353_v2 }
 0x42d   :  { %v1355_v54 = vpop.xlane.xlu0 %1354  ;;  %v1405_v3 = vpack.c.bf16 %v1391_v30, %v1390_v49 }
 0x42e   :  { %2690 = vrcp.f32 %v1355_v54 }
 0x42f   :  { %2328 = vmatmul.mubr.bf16.vlgmr.msra.gmra.mrb[48].mxu1 %v1405_v3 }
 0x430   :  { %2344 = vmatpush3.bf16.xpose.msra.mxu1 %v1598_v51 }
 0x431   :  { %2496 = vmatprep.subr.msk.bf16.mxu1 %vm1098_vm0, %v3232_v25  ;;  %v1604_v25 = vsel %vm1098_vm0, %v3242_v38, 0 }
 0x432   :  { %v2685_v32 = vpop.eup %2684 }
 0x433   :  { %v1392_v60 = vmul.f32 %v2685_v32, %v3562_v52 }
 0x434   :  { %v2687_v16 = vpop.eup %2686 }
 0x435   :  { %v1393_v55 = vmul.f32 %v2687_v16, %v3565_v14 }
 0x436   :  { %v2689_v0 = vpop.eup %2688 }
 0x437   :  { %v1357_v58 = vpop.xlane.xlu1 %1356  ;;  %v1406_v61 = vpack.c.bf16 %v1393_v55, %v1392_v60  ;;  %v1394_v59 = vmul.f32 %v2689_v0, %v3569_v42 }
 0x438   :  { %v2691_v27 = vpop.eup %2690  ;;  %2692 = vrcp.f32 %v1357_v58  ;;  %2346 = vmatpush3.bf16.xpose.msra.mxu1 %v1601_v57 }
 0x439   :  { %2497 = vmatprep.subr.msk.bf16.mxu1 %vm1098_vm0, %v3242_v38  ;;  %v1359_v12 = vpop.xlane.xlu0 %1358  ;;  %2331 = vmatprep.mubr.bf16.mxu1 %v1406_v61  ;;  %v1395_v52 = vmul.f32 %v2691_v27, %v3573_v4 }
 0x43a   :  { %2694 = vrcp.f32 %v1359_v12 }
 0x43b   :  { %v1361_v14 = vpop.xlane.xlu1 %1360  ;;  %v1407_v10 = vpack.c.bf16 %v1395_v52, %v1394_v59 }
 0x43c   :  { %2696 = vrcp.f32 %v1361_v14 }
 0x43d   :  { %v1363_v11 = vpop.xlane.xlu0 %1362  ;;  %2332 = vmatmul.mubr.bf16.gmra.mrb[52].mxu1 %v1407_v10 }
 0x43e   :  { %2698 = vrcp.f32 %v1363_v11 }
 0x440   :  { %2348 = vmatpush3.bf16.xpose.msra.mxu1 %v1604_v25 }
 0x441   :  { %2498 = vmatprep.subr.msk.bf16.mxu1 %vm1098_vm0, %v3253_v7  ;;  %v1610_v7 = vsel %vm1098_vm0, %v3267_v21, 0 }
 0x442   :  { %v2693_v23 = vpop.eup %2692 }
 0x443   :  { %v1396_v42 = vmul.f32 %v2693_v23, %v3578_v53 }
 0x444   :  { %v2695_v24 = vpop.eup %2694 }
 0x445   :  { %v1397_v4 = vmul.f32 %v2695_v24, %v3581_v31 }
 0x446   :  { %v2697_v36 = vpop.eup %2696 }
 0x447   :  { %v1365_v37 = vpop.xlane.xlu1 %1364  ;;  %v1408_v6 = vpack.c.bf16 %v1397_v4, %v1396_v42  ;;  %v1398_v20 = vmul.f32 %v2697_v36, %v3585_v43 }
 0x448   :  { %v2699_v19 = vpop.eup %2698  ;;  %2700 = vrcp.f32 %v1365_v37  ;;  %2350 = vmatpush3.bf16.xpose.msra.mxu1 %v1607_v5 }
 0x449   :  { %2499 = vmatprep.subr.msk.bf16.mxu1 %vm1098_vm0, %v3267_v21  ;;  %v1367_v38 = vpop.xlane.xlu0 %1366  ;;  %2335 = vmatprep.mubr.bf16.mxu1 %v1408_v6  ;;  %v1399_v53 = vmul.f32 %v2699_v19, %v3589_v47 }
 0x44a   :  { %2702 = vrcp.f32 %v1367_v38 }
 0x44b   :  { %v1369_v31 = vpop.xlane.xlu1 %1368  ;;  %v1409_v33 = vpack.c.bf16 %v1399_v53, %v1398_v20 }
 0x44c   :  { %2704 = vrcp.f32 %v1369_v31 }
 0x44d   :  { %v1371_v34 = vpop.xlane.xlu0 %1370  ;;  %2336 = vmatmul.mubr.bf16.gmra.mrb[56].mxu1 %v1409_v33 }
 0x44e   :  { %2706 = vrcp.f32 %v1371_v34 }
 0x44f   :  { %v1558_v54 = vpop.permute.xlu1 %1557 }
 0x450   :  { %2352 = vmatpush3.bf16.xpose.msra.mxu1 %v1610_v7 }
 0x451   :  { %2500 = vmatprep.subr.msk.bf16.mxu1 %vm1098_vm0, %v3281_v35  ;;  %v1619_v35 = vsel %vm1098_vm0, %v3309_v50, 0 }
 0x452   :  { %v2701_v44 = vpop.eup %2700 }
 0x453   :  { %v1400_v43 = vmul.f32 %v2701_v44, %v3594_v63  ;;  %v1616_v63 = vsel %vm1098_vm0, %v3295_v15, 0 }
 0x454   :  { %v2703_v45 = vpop.eup %2702 }
 0x455   :  { %v1401_v47 = vmul.f32 %v2703_v45, %v3597_v62  ;;  %v1560_v62 = vpop.permute.xlu0 %1559 }
 0x456   :  { %v2705_v9 = vpop.eup %2704 }
 0x457   :  { %v1410_v28 = vpack.c.bf16 %v1401_v47, %v1400_v43  ;;  %v1402_v21 = vmul.f32 %v2705_v9, %v3600_v1  ;;  %v1562_v1 = vpop.permute.xlu1 %1561 }
 0x458   :  { %v2707_v49 = vpop.eup %2706  ;;  %2354 = vmatpush3.bf16.xpose.msra.mxu1 %v1613_v18 }
 0x459   :  { %2501 = vmatprep.subr.msk.bf16.mxu1 %vm1098_vm0, %v3295_v15  ;;  %2339 = vmatprep.mubr.bf16.mxu1 %v1410_v28  ;;  %v1403_v30 = vmul.f32 %v2707_v49, %v3603_v40  ;;  %v1566_v40 = vpop.permute.xlu0 %1565 }
 0x45b   :  { %v1411_v2 = vpack.c.bf16 %v1403_v30, %v1402_v21  ;;  %v1564_v15 = vpop.permute.xlu1 %1563  ;;  %v3989_v30 = vld [vmem:[#allocation14_spill] sm:$0xff] }
 0x45d   :  { %2340 = vmatmul.mubr.bf16.gmra.mrb[60].mxu1 %v1411_v2 }
 0x45e   :  { %2359 = vmatprep.mubr.msk.bf16.mxu1 %vm1098_vm0, %v1558_v54 }
 0x460   :  { %2356 = vmatpush3.bf16.xpose.msra.mxu1 %v1616_v63 }
 0x461   :  { %2502 = vmatprep.subr.msk.bf16.mxu1 %vm1098_vm0, %v3309_v50  ;;  %v1570_v50 = vpop.permute.xlu0 %1569 }
 0x468   :  { %2358 = vmatpush3.bf16.xpose.msra.mxu1 %v1619_v35 }
 0x469   :  { %2375 = vmatprep.subr.bf16.mxu1 %v3224_v13 }
 0x46f   :  { %2360 = vmatmul.mubr.msk.bf16.vlgmr.msra.gmra.mrb[64].mxu1 %vm1098_vm0, %v1560_v62 }
 0x470   :  { %2363 = vmatprep.mubr.msk.bf16.mxu1 %vm1098_vm0, %v1562_v1  ;;  %2376 = vmatpush3.bf16.msra.mxu1 %v3224_v13  ;;  %v1568_v13 = vpop.permute.xlu1 %1567 }
 0x471   :  { %2377 = vmatprep.subr.bf16.mxu1 %v3234_v26 }
 0x474   :  { %2378 = vmatpush3.bf16.msra.mxu1 %v3234_v26  ;;  %v1572_v26 = vpop.permute.xlu1 %1571 }
 0x475   :  { %2379 = vmatprep.subr.bf16.mxu1 %v3244_v39 }
 0x477   :  { %2364 = vmatmul.mubr.msk.bf16.gmra.mrb[68].mxu1 %vm1098_vm0, %v1564_v15 }
 0x478   :  { %2367 = vmatprep.mubr.msk.bf16.mxu1 %vm1098_vm0, %v1566_v40  ;;  %2380 = vmatpush3.bf16.msra.mxu1 %v3244_v39 }
 0x479   :  { %2381 = vmatprep.subr.bf16.mxu1 %v3255_v8 }
 0x47c   :  { %2382 = vmatpush3.bf16.msra.mxu1 %v3255_v8 }
 0x47d   :  { %2383 = vmatprep.subr.bf16.mxu1 %v3269_v22 }
 0x47f   :  { %2368 = vmatmul.mubr.msk.bf16.gmra.mrb[72].mxu1 %vm1098_vm0, %v1568_v13 }
 0x480   :  { %2371 = vmatprep.mubr.msk.bf16.mxu1 %vm1098_vm0, %v1570_v50  ;;  %2384 = vmatpush3.bf16.msra.mxu1 %v3269_v22 }
 0x481   :  { %2385 = vmatprep.subr.bf16.mxu1 %v3283_v41 }
 0x484   :  { %2386 = vmatpush3.bf16.msra.mxu1 %v3283_v41 }
 0x485   :  { %2387 = vmatprep.subr.bf16.mxu1 %v3297_v46 }
 0x487   :  { %2372 = vmatmul.mubr.msk.bf16.gmra.mrb[76].mxu1 %vm1098_vm0, %v1572_v26 }
 0x488   :  { %2388 = vmatpush3.bf16.msra.mxu1 %v3297_v46 }
 0x489   :  { %2389 = vmatprep.subr.bf16.mxu1 %v3311_v29 }
 0x48c   :  { %2390 = vmatpush3.bf16.msra.mxu1 %v3311_v29 }
 0x502   :  { %v3708_v39 = vpop.f32.mrb[48].mxu1 }
 0x503   :  { %v3710_v8 = vpop.f32.mrb[49].mxu1 }
 0x504   :  { %v3712_v22 = vpop.f32.mrb[50].mxu1 }
 0x505   :  { %v3714_v3 = vpop.f32.mrb[51].mxu1 }
 0x510   :  { %v3716_v41 = vpop.f32.mrb[52].mxu1 }
 0x511   :  { %v3718_v51 = vpop.f32.mrb[53].mxu1 }
 0x512   :  { %v3720_v32 = vpop.f32.mrb[54].mxu1 }
 0x513   :  { %v3722_v16 = vpop.f32.mrb[55].mxu1 }
 0x520   :  { %v3724_v46 = vpop.f32.mrb[56].mxu1 }
 0x521   :  { %v3726_v60 = vpop.f32.mrb[57].mxu1 }
 0x522   :  { %v3728_v29 = vpop.f32.mrb[58].mxu1 }
 0x523   :  { %v3730_v55 = vpop.f32.mrb[59].mxu1 }
 0x530   :  { %v3732_v0 = vpop.f32.mrb[60].mxu1 }
 0x531   :  { %v3734_v58 = vpop.f32.mrb[61].mxu1 }
 0x532   :  { %v3736_v57 = vpop.f32.mrb[62].mxu1 }
 0x533   :  { %v3738_v61 = vpop.f32.mrb[63].mxu1 }
 0x542   :  { %v2361_v27 = vpop.f32.mrb[64].mxu1 }
 0x543   :  { %v1655_v12 = vpop.f32.mrb[65].mxu1  ;;  %v1720_v25 = vsel %vm1028_vm3, %v2361_v27, -inf }
 0x544   :  { %v2362_v59 = vpop.f32.mrb[66].mxu1  ;;  %v1718_v52 = vsel %vm1026_vm1, %v1655_v12, -inf  ;;  %vm3990_vm1 = vcmp.le.s32.totalorder %v3367_v48, %v3989_v30 }
 0x545   :  { %1734 = vmax.xlane.f32.xlu0 %v1718_v52  ;;  %v1658_v14 = vpop.f32.mrb[67].mxu1  ;;  %v1721_v56 = vsel %vm1029_vm4, %v2362_v59, -inf }
 0x546   :  { %v1719_v10 = vsel %vm1027_vm2, %v1658_v14, -inf }
 0x547   :  { %1736 = vmax.xlane.f32.xlu1 %v1719_v10 }
 0x549   :  { %1738 = vmax.xlane.f32.xlu0 %v1720_v25 }
 0x54a   :  { %v2365_v23 = vpop.f32.mrb[68].mxu1 }
 0x54b   :  { %v1671_v24 = vpop.f32.mrb[69].mxu1  ;;  %v1724_v6 = vsel %vm1032_vm7, %v2365_v23, -inf }
 0x54c   :  { %v2366_v42 = vpop.f32.mrb[70].mxu1  ;;  %v1722_v37 = vsel %vm1030_vm5, %v1671_v24, -inf }
 0x54d   :  { %1740 = vmax.xlane.f32.xlu0 %v1721_v56  ;;  %1742 = vmax.xlane.f32.xlu1 %v1722_v37  ;;  %v1674_v17 = vpop.f32.mrb[71].mxu1  ;;  %v1725_v34 = vsel %vm1033_vm8, %v2366_v42, -inf }
 0x54e   :  { %v1723_v38 = vsel %vm1031_vm6, %v1674_v17, -inf }
 0x551   :  { %1746 = vmax.xlane.f32.xlu1 %v1724_v6  ;;  %1744 = vmax.xlane.f32.xlu0 %v1723_v38 }
 0x552   :  { %v2369_v20 = vpop.f32.mrb[72].mxu1 }
 0x553   :  { %v1687_v53 = vpop.f32.mrb[73].mxu1  ;;  %v3770_v47 = vsel %vm1036_vm11, %v2369_v20, -inf }
 0x554   :  { %v2370_v31 = vpop.f32.mrb[74].mxu1  ;;  %v1726_v44 = vsel %vm1034_vm9, %v1687_v53, -inf }
 0x555   :  { %1748 = vmax.xlane.f32.xlu0 %v1725_v34  ;;  %1750 = vmax.xlane.f32.xlu1 %v1726_v44  ;;  %v1690_v45 = vpop.f32.mrb[75].mxu1  ;;  %v3782_v2 = vsel %vm3990_vm1, %v2370_v31, -inf }
 0x556   :  { %v3775_v18 = vsel %vm1035_vm10, %v1690_v45, -inf }
 0x559   :  { %1754 = vmax.xlane.f32.xlu1 %v3770_v47  ;;  %1752 = vmax.xlane.f32.xlu0 %v3775_v18 }
 0x55a   :  { %v2373_v28 = vpop.f32.mrb[76].mxu1 }
 0x55b   :  { %v1703_v49 = vpop.f32.mrb[77].mxu1  ;;  %v3794_v1 = vsel %vm1040_vm15, %v2373_v28, -inf }
 0x55c   :  { %v2374_v21 = vpop.f32.mrb[78].mxu1  ;;  %v3787_v63 = vsel %vm1038_vm13, %v1703_v49, -inf }
 0x55d   :  { %1756 = vmax.xlane.f32.xlu0 %v3782_v2  ;;  %1758 = vmax.xlane.f32.xlu1 %v3787_v63  ;;  %v1706_v35 = vpop.f32.mrb[79].mxu1  ;;  %v3806_v50 = vsel %vm1041_vm12, %v2374_v21, -inf }
 0x55e   :  { %v3799_v40 = vsel %vm1039_vm14, %v1706_v35, -inf }
 0x561   :  { %1762 = vmax.xlane.f32.xlu1 %v3794_v1  ;;  %1760 = vmax.xlane.f32.xlu0 %v3799_v40 }
 0x565   :  { %1764 = vmax.xlane.f32.xlu0 %v3806_v50 }
 0x5d2   :  { %v1735_v26 = vpop.xlane.xlu0 %1734 }
 0x5d3   :  { %v1766_v27 = vsub.f32 %v1718_v52, %v1735_v26 }
 0x5d4   :  { %v1737_v12 = vpop.xlane.xlu1 %1736 }
 0x5d5   :  { %v1782_v59 = vmul.f32 1.442695, %v1766_v27  ;;  %v1767_v14 = vsub.f32 %v1719_v10, %v1737_v12 }
 0x5d6   :  { %v1739_v11 = vpop.xlane.xlu0 %1738 }
 0x5d7   :  { %2708 = vpow2.f32 %v1782_v59  ;;  %v1784_v23 = vmul.f32 1.442695, %v1767_v14  ;;  %v1768_v24 = vsub.f32 %v1720_v25, %v1739_v11 }
 0x5d9   :  { %2710 = vpow2.f32 %v1784_v23  ;;  %v1786_v42 = vmul.f32 1.442695, %v1768_v24 }
 0x5da   :  { %v1741_v4 = vpop.xlane.xlu0 %1740  ;;  %v1743_v36 = vpop.xlane.xlu1 %1742 }
 0x5db   :  { %2712 = vpow2.f32 %v1786_v42  ;;  %v1769_v17 = vsub.f32 %v1721_v56, %v1741_v4  ;;  %v1770_v48 = vsub.f32 %v1722_v37, %v1743_v36 }
 0x5dd   :  { %v1788_v5 = vmul.f32 1.442695, %v1769_v17  ;;  %v1790_v19 = vmul.f32 1.442695, %v1770_v48 }
 0x5de   :  { %v1747_v20 = vpop.xlane.xlu1 %1746  ;;  %v1745_v53 = vpop.xlane.xlu0 %1744 }
 0x5df   :  { %2714 = vpow2.f32 %v1788_v5  ;;  %v1772_v52 = vsub.f32 %v1724_v6, %v1747_v20  ;;  %v1771_v31 = vsub.f32 %v1723_v38, %v1745_v53 }
 0x5e0   :  { %2716 = vpow2.f32 %v1790_v19 }
 0x5e1   :  { %v3809_v10 = vpop.eup %2708  ;;  %v1794_v33 = vmul.f32 1.442695, %v1772_v52  ;;  %v1792_v7 = vmul.f32 1.442695, %v1771_v31 }
 0x5e2   :  { %v1749_v25 = vpop.xlane.xlu0 %1748  ;;  %v1751_v45 = vpop.xlane.xlu1 %1750  ;;  %1814 = vadd.xlane.f32.xlu1 %v3809_v10 }
 0x5e3   :  { %v3812_v43 = vpop.eup %2710  ;;  %2718 = vpow2.f32 %v1794_v33  ;;  %v1773_v56 = vsub.f32 %v1725_v34, %v1749_v25  ;;  %v1774_v37 = vsub.f32 %v1726_v44, %v1751_v45 }
 0x5e4   :  { %2720 = vpow2.f32 %v1792_v7  ;;  %1816 = vadd.xlane.f32.xlu0 %v3812_v43 }
 0x5e5   :  { %v3815_v9 = vpop.eup %2712  ;;  %v1796_v6 = vmul.f32 1.442695, %v1773_v56  ;;  %v1798_v38 = vmul.f32 1.442695, %v1774_v37 }
 0x5e6   :  { %v1755_v28 = vpop.xlane.xlu1 %1754  ;;  %v1753_v49 = vpop.xlane.xlu0 %1752  ;;  %1818 = vadd.xlane.f32.xlu1 %v3815_v9 }
 0x5e7   :  { %2722 = vpow2.f32 %v1796_v6  ;;  %v1776_v21 = vsub.f32 %v3770_v47, %v1755_v28  ;;  %v1775_v30 = vsub.f32 %v3775_v18, %v1753_v49 }
 0x5e8   :  { %2724 = vpow2.f32 %v1798_v38 }
 0x5e9   :  { %v3820_v54 = vpop.eup %2714  ;;  %v1802_v34 = vmul.f32 1.442695, %v1776_v21  ;;  %v1800_v44 = vmul.f32 1.442695, %v1775_v30 }
 0x5ea   :  { %v3822_v35 = vpop.eup %2716  ;;  %v1757_v62 = vpop.xlane.xlu0 %1756  ;;  %1820 = vadd.xlane.f32.xlu0 %v3820_v54 }
 0x5eb   :  { %v1759_v15 = vpop.xlane.xlu1 %1758  ;;  %2726 = vpow2.f32 %v1802_v34  ;;  %v1777_v13 = vsub.f32 %v3782_v2, %v1757_v62  ;;  %1822 = vadd.xlane.f32.xlu1 %v3822_v35 }
 0x5ec   :  { %v1778_v47 = vsub.f32 %v3787_v63, %v1759_v15  ;;  %2728 = vpow2.f32 %v1800_v44 }
 0x5ed   :  { %v3828_v18 = vpop.eup %2718  ;;  %v1804_v26 = vmul.f32 1.442695, %v1777_v13 }
 0x5ee   :  { %v1806_v27 = vmul.f32 1.442695, %v1778_v47  ;;  %v3830_v12 = vpop.eup %2720  ;;  %v1761_v14 = vpop.xlane.xlu0 %1760 }
 0x5ef   :  { %v1763_v59 = vpop.xlane.xlu1 %1762  ;;  %2730 = vpow2.f32 %v1804_v26  ;;  %1826 = vadd.xlane.f32.xlu1 %v3828_v18  ;;  %1824 = vadd.xlane.f32.xlu0 %v3830_v12  ;;  %v1779_v2 = vsub.f32 %v3799_v40, %v1761_v14 }
 0x5f0   :  { %v1780_v11 = vsub.f32 %v3794_v1, %v1763_v59  ;;  %2732 = vpow2.f32 %v1806_v27 }
 0x5f1   :  { %v3836_v63 = vpop.eup %2722  ;;  %v1808_v24 = vmul.f32 1.442695, %v1779_v2 }
 0x5f2   :  { %v1810_v23 = vmul.f32 1.442695, %v1780_v11  ;;  %v3838_v42 = vpop.eup %2724  ;;  %v1765_v4 = vpop.xlane.xlu0 %1764 }
 0x5f3   :  { %1830 = vadd.xlane.f32.xlu1 %v3838_v42  ;;  %1828 = vadd.xlane.f32.xlu0 %v3836_v63  ;;  %v1781_v36 = vsub.f32 %v3806_v50, %v1765_v4 }
 0x5f4   :  { %2734 = vpow2.f32 %v1810_v23 }
 0x5f5   :  { %2736 = vpow2.f32 %v1808_v24  ;;  %v3843_v1 = vpop.eup %2726  ;;  %v1812_v17 = vmul.f32 1.442695, %v1781_v36 }
 0x5f6   :  { %v3845_v40 = vpop.eup %2728 }
 0x5f7   :  { %2738 = vpow2.f32 %v1812_v17  ;;  %1834 = vadd.xlane.f32.xlu1 %v3843_v1  ;;  %1832 = vadd.xlane.f32.xlu0 %v3845_v40 }
 0x5f9   :  { %v3849_v48 = vpop.eup %2730 }
 0x5fa   :  { %v3851_v5 = vpop.eup %2732 }
 0x5fb   :  { %1838 = vadd.xlane.f32.xlu1 %v3851_v5  ;;  %1836 = vadd.xlane.f32.xlu0 %v3849_v48 }
 0x5fe   :  { %v3855_v50 = vpop.eup %2734 }
 0x5ff   :  { %v3857_v19 = vpop.eup %2736  ;;  %1842 = vadd.xlane.f32.xlu1 %v3855_v50 }
 0x600   :  { %1840 = vadd.xlane.f32.xlu0 %v3857_v19 }
 0x601   :  { %v3861_v20 = vpop.eup %2738 }
 0x604   :  { %1844 = vadd.xlane.f32.xlu0 %v3861_v20 }
 0x66f   :  { %v1815_v53 = vpop.xlane.xlu1 %1814 }
 0x670   :  { %2740 = vrcp.f32 %v1815_v53 }
 0x671   :  { %v1817_v52 = vpop.xlane.xlu0 %1816 }
 0x672   :  { %2742 = vrcp.f32 %v1817_v52 }
 0x673   :  { %v1819_v31 = vpop.xlane.xlu1 %1818 }
 0x674   :  { %2744 = vrcp.f32 %v1819_v31 }
 0x677   :  { %v1821_v33 = vpop.xlane.xlu0 %1820 }
 0x678   :  { %v1823_v7 = vpop.xlane.xlu1 %1822  ;;  %2746 = vrcp.f32 %v1821_v33 }
 0x679   :  { %2748 = vrcp.f32 %v1823_v7 }
 0x67a   :  { %v2741_v25 = vpop.eup %2740 }
 0x67b   :  { %v1862_v6 = vmul.f32 %v2741_v25, %v3809_v10 }
 0x67c   :  { %v2743_v45 = vpop.eup %2742  ;;  %v1827_v56 = vpop.xlane.xlu1 %1826 }
 0x67d   :  { %v1825_v37 = vpop.xlane.xlu0 %1824  ;;  %v1863_v38 = vmul.f32 %v2743_v45, %v3812_v43 }
 0x67e   :  { %2750 = vrcp.f32 %v1825_v37  ;;  %v2745_v49 = vpop.eup %2744 }
 0x67f   :  { %v1878_v28 = vpack.c.bf16 %v1863_v38, %v1862_v6  ;;  %2752 = vrcp.f32 %v1827_v56  ;;  %v1864_v44 = vmul.f32 %v2745_v49, %v3815_v9 }
 0x680   :  { %v1831_v21 = vpop.xlane.xlu1 %1830 }
 0x681   :  { %v1829_v30 = vpop.xlane.xlu0 %1828  ;;  %2391 = vmatprep.mubr.bf16.mxu1 %v1878_v28 }
 0x682   :  { %v2747_v34 = vpop.eup %2746  ;;  %2754 = vrcp.f32 %v1829_v30 }
 0x683   :  { %v1865_v62 = vmul.f32 %v2747_v34, %v3820_v54  ;;  %2756 = vrcp.f32 %v1831_v21  ;;  %v2749_v10 = vpop.eup %2748 }
 0x684   :  { %v1835_v15 = vpop.xlane.xlu1 %1834  ;;  %v1866_v59 = vmul.f32 %v2749_v10, %v3822_v35 }
 0x685   :  { %v1833_v13 = vpop.xlane.xlu0 %1832  ;;  %v1879_v47 = vpack.c.bf16 %v1865_v62, %v1864_v44 }
 0x686   :  { %2758 = vrcp.f32 %v1833_v13 }
 0x687   :  { %2392 = vmatmul.mubr.bf16.vlgmr.msra.gmra.mrb[80].mxu1 %v1879_v47  ;;  %2760 = vrcp.f32 %v1835_v15 }
 0x688   :  { %v2751_v43 = vpop.eup %2750  ;;  %v1839_v26 = vpop.xlane.xlu1 %1838 }
 0x689   :  { %v1837_v27 = vpop.xlane.xlu0 %1836  ;;  %v1867_v14 = vmul.f32 %v2751_v43, %v3830_v12  ;;  %v2753_v11 = vpop.eup %2752 }
 0x68a   :  { %2762 = vrcp.f32 %v1837_v27  ;;  %v1868_v24 = vmul.f32 %v2753_v11, %v3828_v18 }
 0x68b   :  { %v1880_v9 = vpack.c.bf16 %v1867_v14, %v1866_v59  ;;  %2764 = vrcp.f32 %v1839_v26 }
 0x68c   :  { %v2755_v2 = vpop.eup %2754  ;;  %v1843_v54 = vpop.xlane.xlu1 %1842 }
 0x68d   :  { %v1841_v23 = vpop.xlane.xlu0 %1840  ;;  %2395 = vmatprep.mubr.bf16.mxu1 %v1880_v9  ;;  %v1869_v4 = vmul.f32 %v2755_v2, %v3836_v63  ;;  %v2757_v36 = vpop.eup %2756 }
 0x68e   :  { %2766 = vrcp.f32 %v1841_v23  ;;  %v1870_v12 = vmul.f32 %v2757_v36, %v3838_v42 }
 0x68f   :  { %2768 = vrcp.f32 %v1843_v54  ;;  %v1881_v17 = vpack.c.bf16 %v1869_v4, %v1868_v24 }
 0x690   :  { %v2759_v53 = vpop.eup %2758 }
 0x691   :  { %v1845_v35 = vpop.xlane.xlu0 %1844  ;;  %2396 = vmatmul.mubr.bf16.gmra.mrb[84].mxu1 %v1881_v17  ;;  %v1871_v52 = vmul.f32 %v2759_v53, %v3845_v40  ;;  %v2761_v31 = vpop.eup %2760 }
 0x692   :  { %2770 = vrcp.f32 %v1845_v35  ;;  %v1872_v18 = vmul.f32 %v2761_v31, %v3843_v1 }
 0x693   :  { %v1882_v33 = vpack.c.bf16 %v1871_v52, %v1870_v12 }
 0x694   :  { %v2763_v7 = vpop.eup %2762 }
 0x695   :  { %2399 = vmatprep.mubr.bf16.mxu1 %v1882_v33  ;;  %v1873_v63 = vmul.f32 %v2763_v7, %v3849_v48  ;;  %v2765_v25 = vpop.eup %2764 }
 0x696   :  { %v1874_v6 = vmul.f32 %v2765_v25, %v3851_v5 }
 0x697   :  { %v1883_v45 = vpack.c.bf16 %v1873_v63, %v1872_v18 }
 0x698   :  { %v2767_v56 = vpop.eup %2766 }
 0x699   :  { %v2769_v37 = vpop.eup %2768  ;;  %2400 = vmatmul.mubr.bf16.gmra.mrb[88].mxu1 %v1883_v45  ;;  %v1875_v38 = vmul.f32 %v2767_v56, %v3857_v19 }
 0x69a   :  { %v1876_v40 = vmul.f32 %v2769_v37, %v3855_v50 }
 0x69b   :  { %v1884_v28 = vpack.c.bf16 %v1875_v38, %v1874_v6 }
 0x69c   :  { %v2771_v42 = vpop.eup %2770 }
 0x69d   :  { %v1877_v49 = vmul.f32 %v2771_v42, %v3861_v20  ;;  %2403 = vmatprep.mubr.bf16.mxu1 %v1884_v28 }
 0x69f   :  { %v1885_v21 = vpack.c.bf16 %v1877_v49, %v1876_v40 }
 0x6a1   :  { %2404 = vmatmul.mubr.bf16.gmra.mrb[92].mxu1 %v1885_v21 }
 0x75a   :  { %v2393_v1 = vpop.f32.mrb[80].mxu1 }
 0x75b   :  { %2011 = vrot.lane.b32.xlu1 %v2393_v1, %s2797_s0  ;;  %v1928_v48 = vpop.f32.mrb[81].mxu1 }
 0x75c   :  { %v2394_v30 = vpop.f32.mrb[82].mxu1 }
 0x75d   :  { %v1931_v34 = vpop.f32.mrb[83].mxu1 }
 0x75e   :  { %2009 = vrot.lane.b32.xlu0 %v1931_v34, %s2797_s0 }
 0x75f   :  { %2007 = vrot.lane.b32.xlu1 %v1928_v48, %s2797_s0 }
 0x763   :  { %2013 = vrot.lane.b32.xlu1 %v2394_v30, %s2797_s0 }
 0x764   :  { %v2397_v5 = vpop.f32.mrb[84].mxu1 }
 0x765   :  { %2019 = vrot.lane.b32.xlu0 %v2397_v5, %s2797_s0  ;;  %v1944_v50 = vpop.f32.mrb[85].mxu1 }
 0x766   :  { %v2398_v19 = vpop.f32.mrb[86].mxu1 }
 0x767   :  { %v1947_v20 = vpop.f32.mrb[87].mxu1  ;;  %2021 = vrot.lane.b32.xlu1 %v2398_v19, %s2797_s0 }
 0x769   :  { %2015 = vrot.lane.b32.xlu0 %v1944_v50, %s2797_s0 }
 0x76b   :  { %2017 = vrot.lane.b32.xlu1 %v1947_v20, %s2797_s0 }
 0x76c   :  { %v2401_v44 = vpop.f32.mrb[88].mxu1 }
 0x76d   :  { %2027 = vrot.lane.b32.xlu0 %v2401_v44, %s2797_s0  ;;  %v1960_v62 = vpop.f32.mrb[89].mxu1 }
 0x76e   :  { %v2402_v15 = vpop.f32.mrb[90].mxu1 }
 0x76f   :  { %v1963_v13 = vpop.f32.mrb[91].mxu1  ;;  %2029 = vrot.lane.b32.xlu1 %v2402_v15, %s2797_s0 }
 0x771   :  { %2023 = vrot.lane.b32.xlu0 %v1960_v62, %s2797_s0 }
 0x773   :  { %2025 = vrot.lane.b32.xlu1 %v1963_v13, %s2797_s0 }
 0x774   :  { %v2405_v47 = vpop.f32.mrb[92].mxu1 }
 0x775   :  { %v1976_v10 = vpop.f32.mrb[93].mxu1 }
 0x776   :  { %2031 = vrot.lane.b32.xlu0 %v1976_v10, %s2797_s0  ;;  %v2406_v43 = vpop.f32.mrb[94].mxu1 }
 0x777   :  { %v1979_v26 = vpop.f32.mrb[95].mxu1 }
 0x778   :  { %2033 = vrot.lane.b32.xlu1 %v1979_v26, %s2797_s0 }
 0x77a   :  { %2035 = vrot.lane.b32.xlu0 %v2405_v47, %s2797_s0 }
 0x77c   :  { %2037 = vrot.lane.b32.xlu1 %v2406_v43, %s2797_s0 }
 0x7cd   :  { %v2012_v27 = vpop.permute.xlu1 %2011 }
 0x7ce   :  { %v2057_v59 = vsel %vm1098_vm0, %v3708_v39, %v2012_v27 }
 0x7cf   :  { %2073 = vst [vmem:[#allocation2 + $0x10] sm:$0xff] %v2057_v59 }
 0x7d0   :  { %v2010_v14 = vpop.permute.xlu0 %2009 }
 0x7d1   :  { %v2056_v11 = vsel %vm1098_vm0, %v3714_v3, %v2010_v14  ;;  %v2008_v9 = vpop.permute.xlu1 %2007 }
 0x7d2   :  { %2072 = vst [vmem:[#allocation2 + $0x8] sm:$0xff] %v2056_v11  ;;  %v2055_v2 = vsel %vm1098_vm0, %v3710_v8, %v2008_v9 }
 0x7d3   :  { %2071 = vst [vmem:[#allocation2] sm:$0xff] %v2055_v2 }
 0x7d5   :  { %v2014_v54 = vpop.permute.xlu1 %2013 }
 0x7d6   :  { %v2058_v23 = vsel %vm1098_vm0, %v3712_v22, %v2014_v54 }
 0x7d7   :  { %2074 = vst [vmem:[#allocation2 + $0x18] sm:$0xff] %v2058_v23  ;;  %v2020_v24 = vpop.permute.xlu0 %2019 }
 0x7d8   :  { %v2061_v39 = vsel %vm1098_vm0, %v3716_v41, %v2020_v24 }
 0x7d9   :  { %2077 = vst [vmem:[#allocation2 + $0x30] sm:$0xff] %v2061_v39  ;;  %v2022_v4 = vpop.permute.xlu1 %2021 }
 0x7da   :  { %v2062_v3 = vsel %vm1098_vm0, %v3720_v32, %v2022_v4 }
 0x7db   :  { %2078 = vst [vmem:[#allocation2 + $0x38] sm:$0xff] %v2062_v3  ;;  %v2016_v36 = vpop.permute.xlu0 %2015 }
 0x7dc   :  { %v2059_v8 = vsel %vm1098_vm0, %v3718_v51, %v2016_v36 }
 0x7dd   :  { %2075 = vst [vmem:[#allocation2 + $0x20] sm:$0xff] %v2059_v8  ;;  %v2018_v17 = vpop.permute.xlu1 %2017 }
 0x7de   :  { %v2060_v22 = vsel %vm1098_vm0, %v3722_v16, %v2018_v17 }
 0x7df   :  { %2076 = vst [vmem:[#allocation2 + $0x28] sm:$0xff] %v2060_v22  ;;  %v2028_v53 = vpop.permute.xlu0 %2027 }
 0x7e0   :  { %v2065_v41 = vsel %vm1098_vm0, %v3724_v46, %v2028_v53 }
 0x7e1   :  { %2081 = vst [vmem:[#allocation2 + $0x50] sm:$0xff] %v2065_v41  ;;  %v2030_v35 = vpop.permute.xlu1 %2029 }
 0x7e2   :  { %v2066_v32 = vsel %vm1098_vm0, %v3728_v29, %v2030_v35 }
 0x7e3   :  { %2082 = vst [vmem:[#allocation2 + $0x58] sm:$0xff] %v2066_v32  ;;  %v2024_v12 = vpop.permute.xlu0 %2023 }
 0x7e4   :  { %v2063_v51 = vsel %vm1098_vm0, %v3726_v60, %v2024_v12 }
 0x7e5   :  { %2079 = vst [vmem:[#allocation2 + $0x40] sm:$0xff] %v2063_v51  ;;  %v2026_v52 = vpop.permute.xlu1 %2025 }
 0x7e6   :  { %v2064_v16 = vsel %vm1098_vm0, %v3730_v55, %v2026_v52 }
 0x7e7   :  { %2080 = vst [vmem:[#allocation2 + $0x48] sm:$0xff] %v2064_v16 }
 0x7e8   :  { %v2032_v31 = vpop.permute.xlu0 %2031 }
 0x7e9   :  { %v2067_v46 = vsel %vm1098_vm0, %v3734_v58, %v2032_v31 }
 0x7ea   :  { %2083 = vst [vmem:[#allocation2 + $0x60] sm:$0xff] %v2067_v46  ;;  %v2034_v33 = vpop.permute.xlu1 %2033 }
 0x7eb   :  { %v2068_v29 = vsel %vm1098_vm0, %v3738_v61, %v2034_v33 }
 0x7ec   :  { %2084 = vst [vmem:[#allocation2 + $0x68] sm:$0xff] %v2068_v29  ;;  %v2036_v7 = vpop.permute.xlu0 %2035 }
 0x7ed   :  { %v2069_v60 = vsel %vm1098_vm0, %v3732_v0, %v2036_v7 }
 0x7ee   :  { %2085 = vst [vmem:[#allocation2 + $0x70] sm:$0xff] %v2069_v60  ;;  %v2038_v18 = vpop.permute.xlu1 %2037 }
 0x7ef   :  { %v2070_v55 = vsel %vm1098_vm0, %v3736_v57, %v2038_v18 }
 0x7f0   :  { %2086 = vst [vmem:[#allocation2 + $0x78] sm:$0xff] %v2070_v55 }
 0x7f1   :  { %2783 = shalt.err (!%p2780_p4)
}
 0x7f2   :  { %s2784_s6 = scalar_lea.hbm %s3942_s2, 2048 }
 0x7f3   :  { %p2785_p5 = scmp.ne.s32.totalorder %s3942_s2, %s2784_s6  ;;  %p2788_p6 = scmp.lt.u32.totalorder %s2784_s6, %s3942_s2 }
 0x7f5   :  { %p2790_p7 = pnand %p2788_p6, %p2785_p5 }
 0x7f7   :  { %2793 = shalt.err (!%p2790_p7)
}
 0x7f8   :  { %s2799_s11 = smov 128   ;;  %s2800_s12 = smov 8  }
 0x7f9   :  { %2098 = dma.vmem_to_hbm [thread:$0]  %s2093_s1, 2048, %s3942_s2, [#allocation3], %s2799_s11, %s2799_s11, %s2800_s12  }
 0x7fa   :  { %2794 = dma.done.wait [#allocation3], 2048  }
 0x7fb   :  { %2795 = vsyncadd [#allocation3], 4294965248 }
 0x7fc   :  { %2102 = vsyncpa [#allocation3], 1 }

</bundles_post_ra>
